<compile_context>
chip_gen: v5e
topology: v5e:2x2
jax: 0.10.0
libtpu: 0.0.40
codegen_flags: <defaults>
</compile_context>

<pallas_src>
import functools

import jax
import jax.numpy as jnp
from jax import lax
from jax.experimental import pallas as pl
from jax.experimental.pallas import tpu as pltpu


def _round_up(a: int, b: int) -> int:
    return (a + b - 1) // b * b


@functools.lru_cache(maxsize=1)
def _tpu_vmem_and_cores():
    """(physical VMEM bytes per TensorCore, TensorCores per chip), conservative fallbacks."""
    vmem_cap = None
    try:
        vmem_cap = int(pltpu.get_tpu_info().vmem_capacity_bytes)
    except Exception:
        vmem_cap = None
    try:
        kind = jax.devices()[0].device_kind.lower()
    except Exception:
        kind = ""
    if vmem_cap is None or vmem_cap <= 0:
        # v5e / v6e have 128 MiB per TC; assume the smaller v7x 64 MiB otherwise.
        vmem_cap = (128 << 20) if ("v5" in kind or "v6" in kind) else (64 << 20)
    n_tc = 2 if ("7x" in kind or "v7" in kind) else 1
    return vmem_cap, n_tc


def _divisor_chunks(hm: int):
    """Hm-chunk candidates: Hm itself first (weight residency), then 256-aligned divisors
    (keeps the 256-wide v6e/v7x MXU contraction fully fed), then 128-aligned, descending."""
    c256 = sorted((c for c in range(256, hm, 256) if hm % c == 0), reverse=True)
    c128 = sorted((c for c in range(128, hm, 128)
                   if hm % c == 0 and c % 256 != 0), reverse=True)
    return [hm] + c256 + c128


def _select_tiling(N, H, Hm, xbytes, budget, n_tc, tile_rows, force_hm_chunk):
    """Pick (tm, tk, vmem_need).  Shrinks tk before tm: tk does not change the weight
    arithmetic intensity, tm does."""
    sub = 8 if xbytes >= 4 else 16

    def need(tm, tk):
        return (4 * tm * H * xbytes          # x + out tiles (double buffered)
                + 4 * tk * H * 2             # W1 + W2 bf16 chunks (double buffered)
                + 2 * tk * 4 + 6 * H * 4     # b1 chunk + gamma/beta/b2 (double buffered)
                + tm * H * (2 + 4)           # xn (bf16) + acc (f32) scratch
                + 2 * tm * tk * 4)           # (tm, tk) f32 intermediate headroom

    n_rounded = _round_up(N, sub)
    tm = min(_round_up(tile_rows, sub), n_rounded)
    # Only split into >= 2 row tiles on multi-TensorCore chips (v7x megacore); on
    # single-TC v5e/v6e a split just doubles weight streaming.
    if n_tc >= 2 and _round_up(N, tm) // tm < 2 and N > sub:
        tm = _round_up((N + 1) // 2, sub)

    chunks = [force_hm_chunk] if force_hm_chunk is not None else _divisor_chunks(Hm)
    while True:
        for tk in chunks:
            if need(tm, tk) <= budget:
                return tm, tk, need(tm, tk)
        if tm <= sub:
            # Degenerate fallback: smallest tiles; let the compiler decide.
            return sub, chunks[-1], need(sub, chunks[-1])
        tm = max(_round_up(tm // 2, sub), sub)


def _dense_block_kernel(x_ref, gamma_ref, beta_ref, w1_ref, b1_ref, w2_ref, b2_ref,
                        o_ref, xn_ref, acc_ref, *, approximate_gelu: bool):
    """Grid = (row_tiles, hm_chunks).  Axis 1 reduces over the Hm (= multiplier*H) dim."""
    k = pl.program_id(1)

    @pl.when(k == 0)
    def _init():
        # LayerNorm over the last axis (eps = 1e-5, torch.nn.LayerNorm default), computed
        # once per row tile, cached in bf16 for the MXU.
        x = x_ref[...].astype(jnp.float32)
        mean = jnp.mean(x, axis=-1, keepdims=True)
        xc = x - mean
        var = jnp.mean(xc * xc, axis=-1, keepdims=True)
        inv = lax.rsqrt(var + 1e-5)
        xn = xc * inv * gamma_ref[...] + beta_ref[...]
        xn_ref[...] = xn.astype(jnp.bfloat16)
        # Fold residual + final bias into the accumulator init: the finalize becomes a
        # pure dtype cast (no zero-fill, no extra (tm, H) f32 add).
        acc_ref[...] = x + b2_ref[...]

    # ---- Linear 1 chunk: xn (TM, H) contracted with W1 chunk (TK, H) over H -> (TM, TK).
    #      (tk, H) slabs of the (Hm, H) weight are contiguous DMAs; the NT contraction is
    #      the same MXU pattern as q @ k.T. ----
    h = lax.dot_general(xn_ref[...], w1_ref[...],
                        dimension_numbers=(((1,), (1,)), ((), ())),
                        preferred_element_type=jnp.float32)
    h = h + b1_ref[...]

    # ---- GELU.  Default: exact erf form (torch.nn.GELU()).  Optional tanh-approx moves the
    #      work to the EUP slot for small-H, VALU-bound configs. ----
    if approximate_gelu:
        c = jnp.float32(0.7978845608028654)  # sqrt(2/pi)
        h = 0.5 * h * (1.0 + jnp.tanh(c * (h + 0.044715 * h * h * h)))
    else:
        h = 0.5 * h * (1.0 + lax.erf(h * jnp.float32(0.7071067811865476)))

    # ---- Linear 2 chunk: (TM, TK) @ (TK, H), accumulated into the f32 scratch ----
    acc_ref[...] += jnp.dot(h.astype(jnp.bfloat16), w2_ref[...],
                            preferred_element_type=jnp.float32)

    @pl.when(k == pl.num_programs(1) - 1)
    def _finalize():
        o_ref[...] = acc_ref[...].astype(o_ref.dtype)


@functools.partial(jax.jit,
                   static_argnames=("tile_rows", "force_hm_chunk", "approximate_gelu"))
def attention_dense_block(x, gamma, beta, w1, b1, w2, b2, *, tile_rows=512,
                          force_hm_chunk=None, approximate_gelu=False):
    """Fused LayerNorm -> Linear(H, Hm) -> GELU -> Linear(Hm, H) -> + residual.

    Expected parameter layouts (pre-cast w1/w2 to bf16 once, outside this call):
      gamma, beta : (H,)       LayerNorm affine
      w1          : (Hm, H)    == torch linear.weight        (torch-native (out, in))
      b1          : (Hm,)
      w2          : (Hm, H)    == torch linear_final.weight.T
      b2          : (H,)
    x: (..., H).  Returns the same shape/dtype as x.
    """
    orig_shape = x.shape
    H = orig_shape[-1]
    Hm = w1.shape[0]
    x2d = x.reshape(-1, H)
    N = x2d.shape[0]
    xbytes = x.dtype.itemsize

    # ---- generation-aware VMEM budget and tiling -------------------------------------
    vmem_cap, n_tc = _tpu_vmem_and_cores()
    budget = min(vmem_cap - (8 << 20), 100 << 20)     # ~56 MiB on v7x, ~100 MiB on v5e/v6e
    tm, tk, vmem_need = _select_tiling(N, H, Hm, xbytes, budget, n_tc,
                                       tile_rows, force_hm_chunk)

    n_pad = _round_up(N, tm)
    if n_pad != N:
        # Zero rows are LayerNorm-safe; at most tm-1 padded rows.
        # TODO(synk): for very large N a scalar-prefetched row count + in-kernel tail mask
        # would avoid this (small) extra HBM pass over x.
        x2d = jnp.pad(x2d, ((0, n_pad - N), (0, 0)))
    num_k = Hm // tk
    grid = (n_pad // tm, num_k)

    # ---- operands: bf16 weights for the MXU (pre-cast by caller), f32 affine params ----
    gamma2 = gamma.reshape(1, H).astype(jnp.float32)
    beta2 = beta.reshape(1, H).astype(jnp.float32)
    b1r = b1.reshape(1, Hm).astype(jnp.float32)
    b2r = b2.reshape(1, H).astype(jnp.float32)
    w1b = w1 if w1.dtype == jnp.bfloat16 else w1.astype(jnp.bfloat16)
    w2b = w2 if w2.dtype == jnp.bfloat16 else w2.astype(jnp.bfloat16)

    # Never clamp the limit below the actual footprint; stay under the generation cap.
    vmem_limit = min(max(vmem_need + (4 << 20), min(32 << 20, budget)), budget)
    vmem_limit = int(max(vmem_limit, vmem_need))

    weight_passes = 1 if num_k == 1 else (n_pad // tm)   # resident weights -> one DMA total
    cost = pl.CostEstimate(
        flops=4 * n_pad * H * Hm,                         # two matmuls
        transcendentals=n_pad * Hm,                       # erf / tanh
        bytes_accessed=(n_pad * H * xbytes * 2            # x in + out
                        + weight_passes * (2 * H * Hm * 2)
                        + Hm * 4 + 3 * H * 4),
    )

    kernel = functools.partial(_dense_block_kernel, approximate_gelu=approximate_gelu)

    out = pl.pallas_call(
        kernel,
        out_shape=jax.ShapeDtypeStruct((n_pad, H), x.dtype),
        grid_spec=pltpu.PrefetchScalarGridSpec(
            num_scalar_prefetch=0,
            grid=grid,
            in_specs=[
                pl.BlockSpec((tm, H), lambda i, k: (i, 0)),    # x rows (resident across k)
                pl.BlockSpec((1, H), lambda i, k: (0, 0)),     # gamma
                pl.BlockSpec((1, H), lambda i, k: (0, 0)),     # beta
                pl.BlockSpec((tk, H), lambda i, k: (k, 0)),    # W1 chunk (contiguous slab)
                pl.BlockSpec((1, tk), lambda i, k: (0, k)),    # b1 chunk
                pl.BlockSpec((tk, H), lambda i, k: (k, 0)),    # W2 chunk (contiguous slab)
                pl.BlockSpec((1, H), lambda i, k: (0, 0)),     # b2
            ],
            out_specs=pl.BlockSpec((tm, H), lambda i, k: (i, 0)),
            scratch_shapes=[
                pltpu.VMEM((tm, H), jnp.bfloat16),             # cached LayerNorm output
                pltpu.VMEM((tm, H), jnp.float32),              # output accumulator
            ],
        ),
        compiler_params=pltpu.CompilerParams(
            dimension_semantics=("parallel", "arbitrary"),
            vmem_limit_bytes=vmem_limit,
        ),
        cost_estimate=cost,
    )(x2d, gamma2, beta2, w1b, b1r, w2b, b2r)

    if n_pad != N:
        out = out[:N]
    return out.reshape(orig_shape)


def init_params(key, inner_size, multiplier=4, dtype=jnp.float32):
    """Deterministic synthetic parameters matching the PyTorch module's shapes/layouts."""
    k1, k2, k3, k4 = jax.random.split(key, 4)
    H = inner_size
    Hm = inner_size * multiplier
    gamma = jnp.ones((H,), dtype)                       # LayerNorm default init
    beta = jnp.zeros((H,), dtype)
    # w1: (Hm, H) == torch linear.weight; w2: (Hm, H) == torch linear_final.weight.T
    w1 = (jax.random.normal(k1, (Hm, H), dtype) * (H ** -0.5)).astype(dtype)
    b1 = (jax.random.normal(k2, (Hm,), dtype) * 0.02).astype(dtype)
    w2 = (jax.random.normal(k3, (Hm, H), dtype) * (Hm ** -0.5)).astype(dtype)
    b2 = (jax.random.normal(k4, (H,), dtype) * 0.02).astype(dtype)
    return gamma, beta, w1, b1, w2, b2


def _reference(x, gamma, beta, w1, b1, w2, b2):
    # Pure-JAX f32 reference (matches the PyTorch module semantics).
    mean = jnp.mean(x, axis=-1, keepdims=True)
    var = jnp.mean((x - mean) ** 2, axis=-1, keepdims=True)
    xn = (x - mean) * lax.rsqrt(var + 1e-5) * gamma + beta
    h = xn @ w1.T + b1
    h = 0.5 * h * (1.0 + lax.erf(h / jnp.sqrt(2.0)))
    return x + (h @ w2 + b2)


if __name__ == "__main__":
    inner_size = 128      # lane-dense hidden (multiple of 128) -> unmasked vector stores
    multiplier = 4        # Hm = 512
    batch, seq = 2, 16    # rows = 32

    key = jax.random.PRNGKey(0)
    kx, kp = jax.random.split(key)
    x = jax.random.normal(kx, (batch, seq, inner_size), jnp.float32)
    gamma, beta, w1, b1, w2, b2 = init_params(kp, inner_size, multiplier)

    # Pre-cast the MXU weights to bf16 ONCE, outside the per-call jit (no per-call HBM
    # weight re-write).  Biases / LayerNorm affine stay f32.
    w1_bf16 = w1.astype(jnp.bfloat16)
    w2_bf16 = w2.astype(jnp.bfloat16)

    ref = _reference(x, gamma, beta, w1, b1, w2, b2)

    # 1) Default path: weights fit VMEM -> single Hm chunk, weights resident across row tiles.
    out = attention_dense_block(x, gamma, beta, w1_bf16, b1, w2_bf16, b2)
    out = jax.block_until_ready(out)
    assert out.shape == x.shape and out.dtype == x.dtype
    assert jnp.allclose(out, ref, atol=5e-2, rtol=5e-2), "mismatch vs reference (resident)"

    # 2) Forced Hm chunking (tk=256): exercises the accumulate/finalize reduction path.
    out2 = attention_dense_block(x, gamma, beta, w1_bf16, b1, w2_bf16, b2,
                                 force_hm_chunk=256)
    out2 = jax.block_until_ready(out2)
    assert jnp.allclose(out2, ref, atol=5e-2, rtol=5e-2), "mismatch vs reference (chunked)"

    print("KERNEL_OK")
</pallas_src>

<mosaic_0001>
module attributes {stable_mosaic.version = 11 : i64} {
  func.func @_dense_block_kernel(%arg0: i32, %arg1: i32, %arg2: memref<32x128xf32, #tpu.memory_space<vmem>>, %arg3: memref<1x128xf32, #tpu.memory_space<vmem>>, %arg4: memref<1x128xf32, #tpu.memory_space<vmem>>, %arg5: memref<512x128xbf16, #tpu.memory_space<vmem>>, %arg6: memref<1x512xf32, #tpu.memory_space<vmem>>, %arg7: memref<512x128xbf16, #tpu.memory_space<vmem>>, %arg8: memref<1x128xf32, #tpu.memory_space<vmem>>, %arg9: memref<32x128xf32, #tpu.memory_space<vmem>>, %arg10: memref<32x128xbf16, #tpu.memory_space<vmem>>, %arg11: memref<32x128xf32, #tpu.memory_space<vmem>>) attributes {dimension_semantics = [#tpu.dimension_semantics<parallel>, #tpu.dimension_semantics<arbitrary>], iteration_bounds = array<i64: 1, 1>, scalar_prefetch = 0 : i64, scratch_operands = 2 : i64, tpu.core_type = #tpu.core_type<tc>, window_params = [{transform_indices = @transform_0, window_bounds = array<i64: 32, 128>}, {pipeline_mode = #tpu.pipeline_mode<synchronous>, transform_indices = @transform_1, window_bounds = array<i64: 1, 128>}, {pipeline_mode = #tpu.pipeline_mode<synchronous>, transform_indices = @transform_2, window_bounds = array<i64: 1, 128>}, {transform_indices = @transform_3, window_bounds = array<i64: 512, 128>}, {transform_indices = @transform_4, window_bounds = array<i64: 1, 512>}, {transform_indices = @transform_5, window_bounds = array<i64: 512, 128>}, {pipeline_mode = #tpu.pipeline_mode<synchronous>, transform_indices = @transform_6, window_bounds = array<i64: 1, 128>}, {transform_indices = @transform_7, window_bounds = array<i64: 32, 128>}]} {
    %c0_i32 = arith.constant 0 : i32
    %0 = arith.cmpi eq, %arg1, %c0_i32 : i32
    %1 = arith.extui %0 : i1 to i32
    %c0_i32_0 = arith.constant 0 : i32
    %2 = arith.cmpi ne, %1, %c0_i32_0 : i32
    scf.if %2 {
      %c0_18 = arith.constant 0 : index
      %c0_19 = arith.constant 0 : index
      %26 = vector.load %arg2[%c0_18, %c0_19] : memref<32x128xf32, #tpu.memory_space<vmem>>, vector<32x128xf32>
      %cst_20 = arith.constant dense<0.000000e+00> : vector<32xf32>
      %27 = vector.multi_reduction <add>, %26, %cst_20 [1] : vector<32x128xf32> to vector<32xf32>
      %28 = vector.shape_cast %27 : vector<32xf32> to vector<32x1xf32>
      %cst_21 = arith.constant 1.280000e+02 : f32
      %29 = vector.broadcast %cst_21 : f32 to vector<32x1xf32>
      %30 = arith.divf %28, %29 : vector<32x1xf32>
      %31 = vector.broadcast %30 : vector<32x1xf32> to vector<32x128xf32>
      %32 = arith.subf %26, %31 : vector<32x128xf32>
      %33 = arith.mulf %32, %32 : vector<32x128xf32>
      %cst_22 = arith.constant dense<0.000000e+00> : vector<32xf32>
      %34 = vector.multi_reduction <add>, %33, %cst_22 [1] : vector<32x128xf32> to vector<32xf32>
      %35 = vector.shape_cast %34 : vector<32xf32> to vector<32x1xf32>
      %cst_23 = arith.constant 1.280000e+02 : f32
      %36 = vector.broadcast %cst_23 : f32 to vector<32x1xf32>
      %37 = arith.divf %35, %36 : vector<32x1xf32>
      %cst_24 = arith.constant 9.99999974E-6 : f32
      %38 = vector.broadcast %cst_24 : f32 to vector<32x1xf32>
      %39 = arith.addf %37, %38 : vector<32x1xf32>
      %40 = math.rsqrt %39 : vector<32x1xf32>
      %41 = vector.broadcast %40 : vector<32x1xf32> to vector<32x128xf32>
      %42 = arith.mulf %32, %41 : vector<32x128xf32>
      %c0_25 = arith.constant 0 : index
      %c0_26 = arith.constant 0 : index
      %43 = vector.load %arg3[%c0_25, %c0_26] : memref<1x128xf32, #tpu.memory_space<vmem>>, vector<1x128xf32>
      %44 = vector.broadcast %43 : vector<1x128xf32> to vector<32x128xf32>
      %45 = arith.mulf %42, %44 : vector<32x128xf32>
      %c0_27 = arith.constant 0 : index
      %c0_28 = arith.constant 0 : index
      %46 = vector.load %arg4[%c0_27, %c0_28] : memref<1x128xf32, #tpu.memory_space<vmem>>, vector<1x128xf32>
      %47 = vector.broadcast %46 : vector<1x128xf32> to vector<32x128xf32>
      %48 = arith.addf %45, %47 : vector<32x128xf32>
      %49 = arith.truncf %48 : vector<32x128xf32> to vector<32x128xbf16>
      %c0_29 = arith.constant 0 : index
      %c0_30 = arith.constant 0 : index
      %50 = vector.load %arg10[%c0_29, %c0_30] : memref<32x128xbf16, #tpu.memory_space<vmem>>, vector<32x128xbf16>
      tpu.vector_store %arg10[%c0_29, %c0_30], %49 {strides = array<i32>} : memref<32x128xbf16, #tpu.memory_space<vmem>>, vector<32x128xbf16>,
      %c0_31 = arith.constant 0 : index
      %c0_32 = arith.constant 0 : index
      %51 = vector.load %arg8[%c0_31, %c0_32] : memref<1x128xf32, #tpu.memory_space<vmem>>, vector<1x128xf32>
      %52 = vector.broadcast %51 : vector<1x128xf32> to vector<32x128xf32>
      %53 = arith.addf %26, %52 : vector<32x128xf32>
      %c0_33 = arith.constant 0 : index
      %c0_34 = arith.constant 0 : index
      %54 = vector.load %arg11[%c0_33, %c0_34] : memref<32x128xf32, #tpu.memory_space<vmem>>, vector<32x128xf32>
      tpu.vector_store %arg11[%c0_33, %c0_34], %53 {strides = array<i32>} : memref<32x128xf32, #tpu.memory_space<vmem>>, vector<32x128xf32>,
    } else {
    }
    %c0 = arith.constant 0 : index
    %c0_1 = arith.constant 0 : index
    %3 = vector.load %arg10[%c0, %c0_1] : memref<32x128xbf16, #tpu.memory_space<vmem>>, vector<32x128xbf16>
    %c0_2 = arith.constant 0 : index
    %c0_3 = arith.constant 0 : index
    %4 = vector.load %arg5[%c0_2, %c0_3] : memref<512x128xbf16, #tpu.memory_space<vmem>>, vector<512x128xbf16>
    %cst = arith.constant dense<0.000000e+00> : vector<32x512xf32>
    %5 = tpu.matmul %3, %4, %cst {dimension_numbers = #tpu.dot_dimension_numbers<[1], [1], [0], [0], [0, 0, 1, 0], [], []>} : vector<32x128xbf16>, vector<512x128xbf16>, vector<32x512xf32> -> vector<32x512xf32>
    %c0_4 = arith.constant 0 : index
    %c0_5 = arith.constant 0 : index
    %6 = vector.load %arg6[%c0_4, %c0_5] : memref<1x512xf32, #tpu.memory_space<vmem>>, vector<1x512xf32>
    %7 = vector.broadcast %6 : vector<1x512xf32> to vector<32x512xf32>
    %8 = arith.addf %5, %7 : vector<32x512xf32>
    %cst_6 = arith.constant 5.000000e-01 : f32
    %9 = vector.broadcast %cst_6 : f32 to vector<32x512xf32>
    %10 = arith.mulf %9, %8 : vector<32x512xf32>
    %cst_7 = arith.constant 0.707106769 : f32
    %11 = vector.broadcast %cst_7 : f32 to vector<32x512xf32>
    %12 = arith.mulf %8, %11 : vector<32x512xf32>
    %13 = math.erf %12 : vector<32x512xf32>
    %cst_8 = arith.constant 1.000000e+00 : f32
    %14 = vector.broadcast %cst_8 : f32 to vector<32x512xf32>
    %15 = arith.addf %14, %13 : vector<32x512xf32>
    %16 = arith.mulf %10, %15 : vector<32x512xf32>
    %c0_9 = arith.constant 0 : index
    %c0_10 = arith.constant 0 : index
    %17 = vector.load %arg11[%c0_9, %c0_10] : memref<32x128xf32, #tpu.memory_space<vmem>>, vector<32x128xf32>
    %18 = arith.truncf %16 : vector<32x512xf32> to vector<32x512xbf16>
    %c0_11 = arith.constant 0 : index
    %c0_12 = arith.constant 0 : index
    %19 = vector.load %arg7[%c0_11, %c0_12] : memref<512x128xbf16, #tpu.memory_space<vmem>>, vector<512x128xbf16>
    %cst_13 = arith.constant dense<0.000000e+00> : vector<32x128xf32>
    %20 = tpu.matmul %18, %19, %cst_13 {dimension_numbers = #tpu.dot_dimension_numbers<[1], [0], [0], [1], [0, 0, 1, 1], [], []>} : vector<32x512xbf16>, vector<512x128xbf16>, vector<32x128xf32> -> vector<32x128xf32>
    %21 = arith.addf %17, %20 : vector<32x128xf32>
    %c0_14 = arith.constant 0 : index
    %c0_15 = arith.constant 0 : index
    %22 = vector.load %arg11[%c0_14, %c0_15] : memref<32x128xf32, #tpu.memory_space<vmem>>, vector<32x128xf32>
    tpu.vector_store %arg11[%c0_14, %c0_15], %21 {strides = array<i32>} : memref<32x128xf32, #tpu.memory_space<vmem>>, vector<32x128xf32>,
    %c0_i32_16 = arith.constant 0 : i32
    %23 = arith.cmpi eq, %arg1, %c0_i32_16 : i32
    %24 = arith.extui %23 : i1 to i32
    %c0_i32_17 = arith.constant 0 : i32
    %25 = arith.cmpi ne, %24, %c0_i32_17 : i32
    scf.if %25 {
      %c0_18 = arith.constant 0 : index
      %c0_19 = arith.constant 0 : index
      %26 = vector.load %arg11[%c0_18, %c0_19] : memref<32x128xf32, #tpu.memory_space<vmem>>, vector<32x128xf32>
      %c0_20 = arith.constant 0 : index
      %c0_21 = arith.constant 0 : index
      %27 = vector.load %arg9[%c0_20, %c0_21] : memref<32x128xf32, #tpu.memory_space<vmem>>, vector<32x128xf32>
      tpu.vector_store %arg9[%c0_20, %c0_21], %26 {strides = array<i32>} : memref<32x128xf32, #tpu.memory_space<vmem>>, vector<32x128xf32>,
    } else {
    }
    return
  }
  func.func @transform_0(%arg0: i32, %arg1: i32) -> (i32, i32) {
    %c0_i32 = arith.constant 0 : i32
    %c0_i32_0 = arith.constant 0 : i32
    return %arg0, %c0_i32 : i32, i32
  }
  func.func @transform_1(%arg0: i32, %arg1: i32) -> (i32, i32) {
    %c0_i32 = arith.constant 0 : i32
    %c0_i32_0 = arith.constant 0 : i32
    %c0_i32_1 = arith.constant 0 : i32
    return %c0_i32, %c0_i32_0 : i32, i32
  }
  func.func @transform_2(%arg0: i32, %arg1: i32) -> (i32, i32) {
    %c0_i32 = arith.constant 0 : i32
    %c0_i32_0 = arith.constant 0 : i32
    %c0_i32_1 = arith.constant 0 : i32
    return %c0_i32, %c0_i32_0 : i32, i32
  }
  func.func @transform_3(%arg0: i32, %arg1: i32) -> (i32, i32) {
    %c0_i32 = arith.constant 0 : i32
    %c0_i32_0 = arith.constant 0 : i32
    return %arg1, %c0_i32 : i32, i32
  }
  func.func @transform_4(%arg0: i32, %arg1: i32) -> (i32, i32) {
    %c0_i32 = arith.constant 0 : i32
    %c0_i32_0 = arith.constant 0 : i32
    return %c0_i32, %arg1 : i32, i32
  }
  func.func @transform_5(%arg0: i32, %arg1: i32) -> (i32, i32) {
    %c0_i32 = arith.constant 0 : i32
    %c0_i32_0 = arith.constant 0 : i32
    return %arg1, %c0_i32 : i32, i32
  }
  func.func @transform_6(%arg0: i32, %arg1: i32) -> (i32, i32) {
    %c0_i32 = arith.constant 0 : i32
    %c0_i32_0 = arith.constant 0 : i32
    %c0_i32_1 = arith.constant 0 : i32
    return %c0_i32, %c0_i32_0 : i32, i32
  }
  func.func @transform_7(%arg0: i32, %arg1: i32) -> (i32, i32) {
    %c0_i32 = arith.constant 0 : i32
    %c0_i32_0 = arith.constant 0 : i32
    return %arg0, %c0_i32 : i32, i32
  }
}

</mosaic_0001>

<bundles_post_ra>
// kernel: attention_dense_block.1
= control target key start
LH: loop header
LB: loop body
LE: loop exit
PB: predicated region body
PF: predicated region fallthrough
CT: control target
= control target key end

     0   :  { %12 = vsyncpa [#allocation5], 0  ;;  %s3005_s0 = inlined_call_operand.hbm [shape: f32[32,128], index: 0, kind: input, shape index: {}]   ;;  %s3006_s1 = inlined_call_operand.vmem [shape: f32[1,128], index: 1, kind: input, shape index: {}]   ;;  %s3007_s2 = inlined_call_operand.vmem [shape: f32[1,128], index: 2, kind: input, shape index: {}]   ;;  %s3008_s3 = inlined_call_operand.hbm [shape: bf16[512,128], index: 3, kind: input, shape index: {}]   ;;  %s3009_s4 = inlined_call_operand.vmem [shape: f32[1,512], index: 4, kind: input, shape index: {}]   ;;  %s3010_s5 = inlined_call_operand.hbm [shape: bf16[512,128], index: 5, kind: input, shape index: {}]   ;;  %s3011_s6 = inlined_call_operand.vmem [shape: f32[1,128], index: 6, kind: input, shape index: {}]   ;;  %s3012_s7 = inlined_call_operand.hbm [shape: f32[32,128], index: 7, kind: output, shape index: {}]  }
   0x1   :  { %13 = vsyncpa [#allocation8], 0  ;;  %s36_s26 = sshll.u32 %s3008_s3, 4  ;;  %s37_s26 = int_to_ptr.hbm [resolvable:$true] %s36_s26 }
   0x2   :  { %14 = vsyncpa [#allocation6], 0  ;;  %s2167_s27 = smov [#allocation7]   ;;  %s19_s8 = sshll.u32 %s3005_s0, 4  ;;  %s20_s8 = int_to_ptr.hbm [resolvable:$true] %s19_s8 }
   0x3   :  { %s38_s28 = sshll.u32 %s2167_s27, 4  ;;  %s2168_s9 = smov 64   ;;  %s39_s28 = int_to_ptr.vmem [resolvable:$true] %s38_s28 }
   0x4   :  { %s2169_s10 = smov 4   ;;  %s2170_s11 = smov [#allocation4]  }
   0x5   :  { %44 = dma.hbm_to_vmem [thread:$0]  %s37_s26, 4096, %s39_s28, [#allocation8], %s2168_s9, %s2168_s9, %s2169_s10  }
   0x6   :  { %s21_s12 = sshll.u32 %s2170_s11, 4  ;;  %s2171_s13 = smov 128   ;;  %s22_s12 = int_to_ptr.vmem [resolvable:$true] %s21_s12 }
   0x7   :  { %s2172_s14 = smov 8   ;;  %s51_s16 = sshll.u32 %s3010_s5, 4  ;;  %s52_s16 = int_to_ptr.hbm [resolvable:$true] %s51_s16 }
   0x8   :  { %27 = dma.hbm_to_vmem [thread:$0]  %s20_s8, 512, %s22_s12, [#allocation5], %s2171_s13, %s2171_s13, %s2172_s14  }
   0x9   :  { %s2173_s17 = smov [#allocation9]  }
   0xa   :  { %s53_s0 = sshll.u32 %s2173_s17, 4  ;;  %s54_s0 = int_to_ptr.vmem [resolvable:$true] %s53_s0 }
   0xb   :  { %59 = dma.hbm_to_vmem [thread:$0]  %s52_s16, 4096, %s54_s0, [#allocation8], %s2168_s9, %s2168_s9, %s2169_s10  }
   0xc   :  { %2161 = dma.done.wait [#allocation5], 512  }
   0xd   :  { %2162 = vsyncadd [#allocation5], 4294966784 }
   0xe   :  { %2163 = dma.done.wait [#allocation8], 8192  }
   0xf   :  { %2164 = vsyncadd [#allocation8], 4294959104  ;;  %v80_v0 = vld [vmem:[#allocation4 + $0x10] sm:$0xff]  ;;  %v78_v1 = vld [vmem:[#allocation4] sm:$0xff]  ;;  %v2174_v4 = vmov 128.0   ;;  %s1636_s25 = sshll.u32 %s3012_s7, 4  ;;  %s1637_s25 = int_to_ptr.hbm [resolvable:$true] %s1636_s25 }
  0x10   :  { %86 = vadd.xlane.f32.xlu1 %v80_v0  ;;  %82 = vadd.xlane.f32.xlu0 %v78_v1  ;;  %v81_v2 = vld [vmem:[#allocation4 + $0x18] sm:$0xff]  ;;  %v79_v3 = vld [vmem:[#allocation4 + $0x8] sm:$0xff]  ;;  %2019 = vrcp.f32 %v2174_v4  ;;  %v1938_v13 = vld [vmem:[#allocation7 + $0x30] sm:$0xff] }
  0x11   :  { %v1939_v7 = vld [vmem:[#allocation7 + $0x38] sm:$0xff]  ;;  %v1946_v14 = vld [vmem:[#allocation7 + $0x70] sm:$0xff]  ;;  %v1937_v35 = vld [vmem:[#allocation7 + $0x28] sm:$0xff] }
  0x12   :  { %v1947_v8 = vld [vmem:[#allocation7 + $0x78] sm:$0xff]  ;;  %487 = vmatpush.bf16.xpose.msra.mxu0 %v1939_v7  ;;  %v1954_v15 = vld [vmem:[#allocation7 + $0xb0] sm:$0xff]  ;;  %v1945_v36 = vld [vmem:[#allocation7 + $0x68] sm:$0xff] }
  0x13   :  { %v1955_v9 = vld [vmem:[#allocation7 + $0xb8] sm:$0xff]  ;;  %506 = vmatpush.bf16.xpose.msra.mxu1 %v1947_v8  ;;  %v1962_v16 = vld [vmem:[#allocation7 + $0xf0] sm:$0xff]  ;;  %v1953_v37 = vld [vmem:[#allocation7 + $0xa8] sm:$0xff] }
  0x14   :  { %v1963_v10 = vld [vmem:[#allocation7 + $0xf8] sm:$0xff]  ;;  %525 = vmatpush.bf16.xpose.msra.mxu2 %v1955_v9  ;;  %v1961_v38 = vld [vmem:[#allocation7 + $0xe8] sm:$0xff]  ;;  %v1936_v39 = vld [vmem:[#allocation7 + $0x20] sm:$0xff] }
  0x15   :  { %544 = vmatpush.bf16.xpose.msra.mxu3 %v1963_v10  ;;  %v1944_v40 = vld [vmem:[#allocation7 + $0x60] sm:$0xff]  ;;  %v1935_v43 = vld [vmem:[#allocation7 + $0x18] sm:$0xff]  ;;  %v1934_v47 = vld [vmem:[#allocation7 + $0x10] sm:$0xff] }
  0x16   :  { %v2020_v5 = vpop.eup %2019  ;;  %v1952_v41 = vld [vmem:[#allocation7 + $0xa0] sm:$0xff]  ;;  %v1943_v44 = vld [vmem:[#allocation7 + $0x58] sm:$0xff]  ;;  %v1942_v48 = vld [vmem:[#allocation7 + $0x50] sm:$0xff] }
  0x17   :  { %v91_v6 = vmul.f32 128.0, %v2020_v5  ;;  %vm95_vm0 = vweird.f32 %v2020_v5  ;;  %v1960_v42 = vld [vmem:[#allocation7 + $0xe0] sm:$0xff]  ;;  %v1951_v45 = vld [vmem:[#allocation7 + $0x98] sm:$0xff]  ;;  %v1950_v49 = vld [vmem:[#allocation7 + $0x90] sm:$0xff] }
  0x18   :  { %88 = vadd.xlane.f32.xlu1 %v81_v2  ;;  %84 = vadd.xlane.f32.xlu0 %v79_v3  ;;  %v1959_v46 = vld [vmem:[#allocation7 + $0xd8] sm:$0xff]  ;;  %v1958_v50 = vld [vmem:[#allocation7 + $0xd0] sm:$0xff]  ;;  %v1933_v52 = vld [vmem:[#allocation7 + $0x8] sm:$0xff] }
  0x19   :  { %v92_v11 = vsub.f32 1.0, %v91_v6  ;;  %v1941_v53 = vld [vmem:[#allocation7 + $0x48] sm:$0xff]  ;;  %v1932_v62 = vld [vmem:[#allocation7] sm:$0xff] }
  0x1a   :  { %488 = vmatpush.bf16.xpose.msra.mxu0 %v1938_v13  ;;  %v1949_v54 = vld [vmem:[#allocation7 + $0x88] sm:$0xff]  ;;  %v1940_v63 = vld [vmem:[#allocation7 + $0x40] sm:$0xff] }
  0x1b   :  { %v93_v12 = vmul.f32 %v2020_v5, %v92_v11  ;;  %507 = vmatpush.bf16.xpose.msra.mxu1 %v1946_v14  ;;  %v1957_v57 = vld [vmem:[#allocation7 + $0xc8] sm:$0xff] }
  0x1c   :  { %526 = vmatpush.bf16.xpose.msra.mxu2 %v1954_v15 }
  0x1d   :  { %v94_v17 = vadd.f32 %v2020_v5, %v93_v12  ;;  %545 = vmatpush.bf16.xpose.msra.mxu3 %v1962_v16 }
  0x1f   :  { %v2228_v18 = vsel %vm95_vm0, %v2020_v5, %v94_v17 }
  0x22   :  { %489 = vmatpush.bf16.xpose.msra.mxu0 %v1937_v35 }
  0x23   :  { %508 = vmatpush.bf16.xpose.msra.mxu1 %v1945_v36 }
  0x24   :  { %527 = vmatpush.bf16.xpose.msra.mxu2 %v1953_v37 }
  0x25   :  { %546 = vmatpush.bf16.xpose.msra.mxu3 %v1961_v38 }
  0x2a   :  { %490 = vmatpush.bf16.xpose.msra.mxu0 %v1936_v39 }
  0x2b   :  { %509 = vmatpush.bf16.xpose.msra.mxu1 %v1944_v40 }
  0x2c   :  { %528 = vmatpush.bf16.xpose.msra.mxu2 %v1952_v41  ;;  %v2018_v41 = vld [vmem:[%s3007_s2] ss:$0 sm:$0xff] }
  0x2d   :  { %547 = vmatpush.bf16.xpose.msra.mxu3 %v1960_v42 }
  0x32   :  { %491 = vmatpush.bf16.xpose.msra.mxu0 %v1935_v43 }
  0x33   :  { %510 = vmatpush.bf16.xpose.msra.mxu1 %v1943_v44 }
  0x34   :  { %529 = vmatpush.bf16.xpose.msra.mxu2 %v1951_v45 }
  0x35   :  { %548 = vmatpush.bf16.xpose.msra.mxu3 %v1959_v46 }
  0x3a   :  { %492 = vmatpush.bf16.xpose.msra.mxu0 %v1934_v47 }
  0x3b   :  { %511 = vmatpush.bf16.xpose.msra.mxu1 %v1942_v48 }
  0x3c   :  { %530 = vmatpush.bf16.xpose.msra.mxu2 %v1950_v49 }
  0x3d   :  { %549 = vmatpush.bf16.xpose.msra.mxu3 %v1958_v50 }
  0x42   :  { %493 = vmatpush.bf16.xpose.msra.mxu0 %v1933_v52 }
  0x43   :  { %512 = vmatpush.bf16.xpose.msra.mxu1 %v1941_v53 }
  0x44   :  { %531 = vmatpush.bf16.xpose.msra.mxu2 %v1949_v54 }
  0x45   :  { %550 = vmatpush.bf16.xpose.msra.mxu3 %v1957_v57 }
  0x4a   :  { %494 = vmatpush.bf16.xpose.msra.mxu0 %v1932_v62 }
  0x4b   :  { %513 = vmatpush.bf16.xpose.msra.mxu1 %v1940_v63 }
  0x83   :  { %v87_v19 = vpop.xlane.xlu1 %86  ;;  %v83_v21 = vpop.xlane.xlu0 %82 }
  0x84   :  { %v99_v20 = vmul.f32 %v2228_v18, %v87_v19  ;;  %v97_v22 = vmul.f32 %v2228_v18, %v83_v21 }
  0x86   :  { %v2232_v23 = vsub.f32 %v80_v0, %v99_v20  ;;  %v2234_v24 = vsub.f32 %v78_v1, %v97_v22  ;;  %v1948_v0 = vld [vmem:[#allocation7 + $0x80] sm:$0xff] }
  0x87   :  { %532 = vmatpush.bf16.xpose.msra.mxu2 %v1948_v0 }
  0x88   :  { %v107_v25 = vmul.f32 %v2232_v23, %v2232_v23  ;;  %v105_v26 = vmul.f32 %v2234_v24, %v2234_v24 }
  0x8a   :  { %113 = vadd.xlane.f32.xlu0 %v107_v25  ;;  %109 = vadd.xlane.f32.xlu2 %v105_v26 }
  0x8b   :  { %v89_v27 = vpop.xlane.xlu1 %88  ;;  %v85_v29 = vpop.xlane.xlu0 %84 }
  0x8c   :  { %v100_v28 = vmul.f32 %v2228_v18, %v89_v27  ;;  %v98_v30 = vmul.f32 %v2228_v18, %v85_v29 }
  0x8e   :  { %v2242_v31 = vsub.f32 %v81_v2, %v100_v28  ;;  %v2244_v32 = vsub.f32 %v79_v3, %v98_v30  ;;  %v1956_v3 = vld [vmem:[#allocation7 + $0xc0] sm:$0xff] }
  0x8f   :  { %551 = vmatpush.bf16.xpose.msra.mxu3 %v1956_v3 }
  0x90   :  { %v108_v33 = vmul.f32 %v2242_v31, %v2242_v31  ;;  %v106_v34 = vmul.f32 %v2244_v32, %v2244_v32 }
  0x92   :  { %115 = vadd.xlane.f32.xlu1 %v108_v33  ;;  %111 = vadd.xlane.f32.xlu2 %v106_v34  ;;  %v2017_v34 = vld [vmem:[%s3006_s1] ss:$0 sm:$0xff] }
  0xfd   :  { %v114_v51 = vpop.xlane.xlu0 %113  ;;  %v110_v55 = vpop.xlane.xlu2 %109 }
  0xfe   :  { %v119_v56 = vmul.f32 %v114_v51, %v2228_v18  ;;  %v117_v58 = vmul.f32 %v110_v55, %v2228_v18 }
 0x100   :  { %v123_v59 = vadd.f32 1e-05, %v119_v56  ;;  %v121_v60 = vadd.f32 1e-05, %v117_v58 }
 0x102   :  { %2021 = vrsqrt.f32 %v123_v59  ;;  %vm151_vm1 = vweird.f32 %v123_v59  ;;  %vm131_vm5 = vweird.f32 %v121_v60 }
 0x103   :  { %2023 = vrsqrt.f32 %v121_v60 }
 0x105   :  { %v116_v61 = vpop.xlane.xlu1 %115  ;;  %v112_v2 = vpop.xlane.xlu2 %111 }
 0x106   :  { %v120_v1 = vmul.f32 %v116_v61, %v2228_v18  ;;  %v118_v4 = vmul.f32 %v112_v2, %v2228_v18 }
 0x108   :  { %v2022_v5 = vpop.eup %2021  ;;  %v124_v6 = vadd.f32 1e-05, %v120_v1  ;;  %v122_v9 = vadd.f32 1e-05, %v118_v4 }
 0x109   :  { %v2024_v7 = vpop.eup %2023  ;;  %v146_v8 = vmul.f32 %v2022_v5, %v123_v59  ;;  %vm152_vm2 = vweird.f32 %v2022_v5 }
 0x10a   :  { %v126_v10 = vmul.f32 %v2024_v7, %v121_v60  ;;  %2025 = vrsqrt.f32 %v124_v6  ;;  %vm132_vm3 = vweird.f32 %v2024_v7  ;;  %vm153_vm4 = vmor %vm151_vm1, %vm152_vm2  ;;  %vm161_vm7 = vweird.f32 %v124_v6 }
 0x10b   :  { %v147_v11 = vmul.f32 %v2022_v5, %v146_v8  ;;  %2027 = vrsqrt.f32 %v122_v9  ;;  %vm133_vm6 = vmor %vm131_vm5, %vm132_vm3  ;;  %vm141_vm11 = vweird.f32 %v122_v9 }
 0x10c   :  { %v127_v12 = vmul.f32 %v2024_v7, %v126_v10 }
 0x10d   :  { %v148_v13 = vmul.f32 0.5, %v147_v11 }
 0x10e   :  { %v128_v14 = vmul.f32 0.5, %v127_v12 }
 0x10f   :  { %v149_v15 = vsub.f32 1.5, %v148_v13 }
 0x110   :  { %v2026_v16 = vpop.eup %2025  ;;  %v129_v17 = vsub.f32 1.5, %v128_v14 }
 0x111   :  { %v2028_v18 = vpop.eup %2027  ;;  %v150_v19 = vmul.f32 %v2022_v5, %v149_v15  ;;  %v156_v20 = vmul.f32 %v2026_v16, %v124_v6  ;;  %vm162_vm8 = vweird.f32 %v2026_v16 }
 0x112   :  { %v130_v21 = vmul.f32 %v2024_v7, %v129_v17  ;;  %v136_v22 = vmul.f32 %v2028_v18, %v122_v9  ;;  %vm163_vm9 = vmor %vm161_vm7, %vm162_vm8  ;;  %vm142_vm10 = vweird.f32 %v2028_v18 }
 0x113   :  { %v157_v25 = vmul.f32 %v2026_v16, %v156_v20  ;;  %v154_v27 = vsel %vm153_vm4, %v2022_v5, %v150_v19  ;;  %vm143_vm12 = vmor %vm141_vm11, %vm142_vm10 }
 0x114   :  { %v137_v26 = vmul.f32 %v2028_v18, %v136_v22  ;;  %v134_v29 = vsel %vm133_vm6, %v2024_v7, %v130_v21  ;;  %v167_v35 = vmul.f32 %v154_v27, %v2232_v23 }
 0x115   :  { %v158_v28 = vmul.f32 0.5, %v157_v25  ;;  %v165_v37 = vmul.f32 %v134_v29, %v2234_v24 }
 0x116   :  { %v138_v30 = vmul.f32 0.5, %v137_v26  ;;  %v175_v42 = vmul.f32 %v2017_v34, %v167_v35 }
 0x117   :  { %v159_v33 = vsub.f32 1.5, %v158_v28  ;;  %v173_v45 = vmul.f32 %v2017_v34, %v165_v37 }
 0x118   :  { %v139_v36 = vsub.f32 1.5, %v138_v30  ;;  %v183_v48 = vadd.f32 %v2018_v41, %v175_v42 }
 0x119   :  { %v160_v38 = vmul.f32 %v2026_v16, %v159_v33  ;;  %v181_v49 = vadd.f32 %v2018_v41, %v173_v45 }
 0x11a   :  { %v140_v39 = vmul.f32 %v2028_v18, %v139_v36 }
 0x11b   :  { %v164_v40 = vsel %vm163_vm9, %v2026_v16, %v160_v38 }
 0x11c   :  { %v168_v43 = vmul.f32 %v164_v40, %v2242_v31  ;;  %v144_v44 = vsel %vm143_vm12, %v2028_v18, %v140_v39 }
 0x11d   :  { %v166_v23 = vmul.f32 %v144_v44, %v2244_v32  ;;  %v273_v32 = vld [vmem:[%s3009_s4] sm:$0xf] }
 0x11e   :  { %v176_v46 = vmul.f32 %v2017_v34, %v168_v43  ;;  %v2267_v54 = vperm.slane %v273_v32, 0  ;;  %v2269_v55 = vperm.slane %v273_v32, 1  ;;  %v2283_v62 = vperm.slane %v273_v32, 2 }
 0x11f   :  { %v174_v47 = vmul.f32 %v2017_v34, %v166_v23  ;;  %v2285_v63 = vperm.slane %v273_v32, 3 }
 0x120   :  { %v184_v24 = vadd.f32 %v2018_v41, %v176_v46 }
 0x121   :  { %v182_v50 = vadd.f32 %v2018_v41, %v174_v47 }
 0x122   :  { %v2004_v51 = vpack.c.bf16 %v184_v24, %v183_v48 }
 0x123   :  { %v1999_v52 = vpack.c.bf16 %v182_v50, %v181_v49 }
 0x124   :  { %2006 = vst [vmem:[#allocation2 + $0x8] sm:$0xff] %v2004_v51  }
 0x125   :  { %2000 = vst [vmem:[#allocation2] sm:$0xff] %v1999_v52  }
 0x12b   :  { %v1931_v31 = vld [vmem:[#allocation2 + $0x8] sm:$0xff] }
 0x12c   :  { %v1930_v53 = vld [vmem:[#allocation2] sm:$0xff] }
 0x12d   :  { %495 = vmatmul.bf16.vlgmr.msra.gmra.mxu0 %v1930_v53  ;;  %514 = vmatmul.bf16.vlgmr.msra.gmra.mxu1 %v1930_v53 }
 0x12e   :  { %533 = vmatmul.bf16.vlgmr.msra.gmra.mxu2 %v1930_v53  ;;  %552 = vmatmul.bf16.vlgmr.msra.gmra.mxu3 %v1930_v53 }
 0x13d   :  { %500 = vmatmul.bf16.gmra.mxu0 %v1931_v31  ;;  %519 = vmatmul.bf16.gmra.mxu1 %v1931_v31 }
 0x13e   :  { %538 = vmatmul.bf16.gmra.mxu2 %v1931_v31  ;;  %557 = vmatmul.bf16.gmra.mxu3 %v1931_v31 }
 0x1aa   :  { %v496_v56 = vpop.f32.mrf.mxu0  ;;  %v515_v57 = vpop.f32.mrf.mxu1 }
 0x1ab   :  { %v2272_v58 = vadd.f32 %v496_v56, %v2267_v54  ;;  %v2275_v59 = vadd.f32 %v515_v57, %v2269_v55 }
 0x1ad   :  { %v2278_v60 = vmul.f32 0.70710677, %v2272_v58  ;;  %v2281_v61 = vmul.f32 0.70710677, %v2275_v59 }
 0x1af   :  { %v595_v0 = vmul.f32 %v2278_v60, %v2278_v60  ;;  %v635_v1 = vmul.f32 %v2281_v61, %v2281_v61 }
 0x1b1   :  { %v2291_v2 = vmin.f32 %v595_v0, 16.0  ;;  %v2293_v3 = vmin.f32 %v635_v1, 16.0  ;;  %v534_v4 = vpop.f32.mrf.mxu2  ;;  %v553_v5 = vpop.f32.mrf.mxu3 }
 0x1b2   :  { %v2296_v6 = vadd.f32 %v534_v4, %v2283_v62  ;;  %v2299_v7 = vadd.f32 %v553_v5, %v2285_v63  ;;  %v498_v36 = vpop.f32.mrf.mxu0 }
 0x1b3   :  { %v597_v8 = vmul.f32 2.1237322e-06, %v2291_v2  ;;  %v608_v9 = vmul.f32 3.8918573e-05, %v2291_v2  ;;  %v637_v10 = vmul.f32 2.1237322e-06, %v2293_v3  ;;  %v499_v45 = vadd.f32 %v498_v36, %v2267_v54 }
 0x1b4   :  { %v648_v11 = vmul.f32 3.8918573e-05, %v2293_v3  ;;  %v2306_v12 = vmul.f32 0.70710677, %v2296_v6  ;;  %v2311_v18 = vmul.f32 0.70710677, %v2299_v7 }
 0x1b5   :  { %v598_v13 = vadd.f32 0.00028619796, %v597_v8  ;;  %v609_v14 = vadd.f32 0.001143296, %v608_v9  ;;  %v638_v15 = vadd.f32 0.00028619796, %v637_v10 }
 0x1b6   :  { %v649_v16 = vadd.f32 0.001143296, %v648_v11  ;;  %v675_v17 = vmul.f32 %v2306_v12, %v2306_v12  ;;  %v715_v26 = vmul.f32 %v2311_v18, %v2311_v18  ;;  %v2336_v31 = vmul.f32 0.70710677, %v499_v45 }
 0x1b7   :  { %v599_v19 = vmul.f32 %v598_v13, %v2291_v2  ;;  %v610_v20 = vmul.f32 %v609_v14, %v2291_v2  ;;  %v639_v21 = vmul.f32 %v638_v15, %v2293_v3  ;;  %v2365_v36 = vmul.f32 0.5, %v2275_v59 }
 0x1b8   :  { %v650_v22 = vmul.f32 %v649_v16, %v2293_v3  ;;  %v2317_v25 = vmin.f32 %v675_v17, 16.0  ;;  %v2324_v35 = vmin.f32 %v715_v26, 16.0  ;;  %v755_v13 = vmul.f32 %v2336_v31, %v2336_v31 }
 0x1b9   :  { %v600_v27 = vadd.f32 0.0036580483, %v599_v19  ;;  %v611_v28 = vadd.f32 0.014752088, %v610_v20  ;;  %v640_v38 = vadd.f32 0.0036580483, %v639_v21 }
 0x1ba   :  { %v651_v29 = vadd.f32 0.014752088, %v650_v22  ;;  %v677_v30 = vmul.f32 2.1237322e-06, %v2317_v25  ;;  %v688_v33 = vmul.f32 3.8918573e-05, %v2317_v25  ;;  %v517_v22 = vpop.f32.mrf.mxu1 }
 0x1bb   :  { %v612_v34 = vmul.f32 %v611_v28, %v2291_v2  ;;  %v601_v37 = vmul.f32 %v600_v27, %v2291_v2  ;;  %v728_v46 = vmul.f32 3.8918573e-05, %v2324_v35  ;;  %v641_v48 = vmul.f32 %v640_v38, %v2293_v3 }
 0x1bc   :  { %v652_v39 = vmul.f32 %v651_v29, %v2293_v3  ;;  %v689_v40 = vadd.f32 0.001143296, %v688_v33  ;;  %v678_v43 = vadd.f32 0.00028619796, %v677_v30  ;;  %v717_v56 = vmul.f32 2.1237322e-06, %v2324_v35 }
 0x1bd   :  { %v613_v41 = vadd.f32 0.112945676, %v612_v34  ;;  %v602_v47 = vadd.f32 0.05243302, %v601_v37  ;;  %v729_v57 = vadd.f32 0.001143296, %v728_v46  ;;  %v518_v38 = vadd.f32 %v517_v22, %v2269_v55 }
 0x1be   :  { %v653_v42 = vadd.f32 0.112945676, %v652_v39  ;;  %v690_v44 = vmul.f32 %v689_v40, %v2317_v25  ;;  %v679_v52 = vmul.f32 %v678_v43, %v2317_v25  ;;  %v642_v1 = vadd.f32 0.05243302, %v641_v48  ;;  %v536_v48 = vpop.f32.mrf.mxu2 }
 0x1bf   :  { %v614_v23 = vmul.f32 %v613_v41, %v2291_v2  ;;  %v603_v0 = vmul.f32 %v602_v47, %v2291_v2  ;;  %v718_v14 = vadd.f32 0.00028619796, %v717_v56  ;;  %v730_v15 = vmul.f32 %v729_v57, %v2324_v35 }
 0x1c0   :  { %v654_v24 = vmul.f32 %v653_v42, %v2293_v3  ;;  %v691_v49 = vadd.f32 0.014752088, %v690_v44  ;;  %v680_v10 = vadd.f32 0.0036580483, %v679_v52  ;;  %v643_v17 = vmul.f32 %v642_v1, %v2293_v3 }
 0x1c1   :  { %v615_v50 = vadd.f32 0.4994258, %v614_v23  ;;  %v604_v16 = vadd.f32 0.18741608, %v603_v0  ;;  %v2354_v21 = vmin.f32 %v755_v13, 16.0  ;;  %v719_v26 = vmul.f32 %v718_v14, %v2324_v35 }
 0x1c2   :  { %v655_v51 = vadd.f32 0.4994258, %v654_v24  ;;  %v692_v53 = vmul.f32 %v691_v49, %v2317_v25  ;;  %v681_v19 = vmul.f32 %v680_v10, %v2317_v25  ;;  %v731_v27 = vadd.f32 0.014752088, %v730_v15 }
 0x1c3   :  { %v616_v32 = vmul.f32 %v615_v50, %v2291_v2  ;;  %v605_v28 = vmul.f32 %v604_v16, %v2291_v2  ;;  %v644_v29 = vadd.f32 0.18741608, %v643_v17  ;;  %v2362_v34 = vmul.f32 0.5, %v2272_v58 }
 0x1c4   :  { %v656_v4 = vmul.f32 %v655_v51, %v2293_v3  ;;  %v693_v5 = vadd.f32 0.112945676, %v692_v53  ;;  %v732_v37 = vmul.f32 %v731_v27, %v2324_v35  ;;  %v682_v40 = vadd.f32 0.05243302, %v681_v19 }
 0x1c5   :  { %v2342_v8 = vadd.f32 1.0, %v616_v32  ;;  %v768_v42 = vmul.f32 3.8918573e-05, %v2354_v21  ;;  %v720_v43 = vadd.f32 0.0036580483, %v719_v26  ;;  %v645_v46 = vmul.f32 %v644_v29, %v2293_v3 }
 0x1c6   :  { %v2344_v9 = vadd.f32 1.0, %v656_v4  ;;  %v694_v11 = vmul.f32 %v693_v5, %v2317_v25  ;;  %v733_v59 = vadd.f32 0.112945676, %v732_v37  ;;  %v757_v44 = vmul.f32 2.1237322e-06, %v2354_v21 }
 0x1c7   :  { %2029 = vrcp.f32 %v2342_v8  ;;  %v606_v23 = vadd.f32 1.1283791, %v605_v28  ;;  %v2381_v47 = vmul.f32 0.5, %v2296_v6  ;;  %v2385_v49 = vmul.f32 0.5, %v2299_v7 }
 0x1c8   :  { %2031 = vrcp.f32 %v2344_v9  ;;  %v695_v20 = vadd.f32 0.4994258, %v694_v11  ;;  %v2387_v50 = vmul.f32 0.5, %v499_v45  ;;  %v2389_v51 = vmul.f32 0.70710677, %v518_v38 }
 0x1c9   :  { %v683_v53 = vmul.f32 %v682_v40, %v2317_v25  ;;  %v734_v32 = vmul.f32 %v733_v59, %v2324_v35  ;;  %v769_v3 = vadd.f32 0.001143296, %v768_v42  ;;  %v721_v6 = vmul.f32 %v720_v43, %v2324_v35 }
 0x1ca   :  { %v696_v30 = vmul.f32 %v695_v20, %v2317_v25  ;;  %v758_v56 = vadd.f32 0.00028619796, %v757_v44  ;;  %v2394_v57 = vmul.f32 0.5, %v518_v38  ;;  %v2397_v0 = vadd.f32 %v536_v48, %v2283_v62 }
 0x1cb   :  { %v2400_v7 = vmul.f32 %v606_v23, %v2278_v60  ;;  %vm623_vm13 = vweird.f32 %v2342_v8  ;;  %v646_v45 = vadd.f32 1.1283791, %v645_v46  ;;  %v770_v1 = vmul.f32 %v769_v3, %v2354_v21 }
 0x1cc   :  { %v2373_v41 = vadd.f32 1.0, %v696_v30  ;;  %v627_v5 = vand.u32 2147483647, %v2342_v8  ;;  %v629_v10 = vand.u32 2147483648, %v2342_v8  ;;  %v795_v11 = vmul.f32 %v2389_v51, %v2389_v51 }
 0x1cd   :  { %v2359_v33 = vpop.eup %2029  ;;  %v684_v60 = vadd.f32 0.18741608, %v683_v53  ;;  %v735_v15 = vadd.f32 0.4994258, %v734_v32  ;;  %v771_v16 = vadd.f32 0.014752088, %v770_v1  ;;  %v759_v20 = vmul.f32 %v758_v56, %v2354_v21 }
 0x1ce   :  { %v2369_v39 = vpop.eup %2031  ;;  %v619_v2 = vmul.f32 %v2359_v33, %v2342_v8  ;;  %2033 = vrcp.f32 %v2373_v41  ;;  %v722_v19 = vadd.f32 0.05243302, %v721_v6  ;;  %v2416_v22 = vmul.f32 0.70710677, %v2397_v0 }
 0x1cf   :  { %v659_v58 = vmul.f32 %v2369_v39, %v2344_v9  ;;  %vm624_vm14 = vweird.f32 %v2359_v33  ;;  %v647_v26 = vmul.f32 %v646_v45, %v2281_v61  ;;  %v667_v27 = vand.u32 2147483647, %v2344_v9 }
 0x1d0   :  { %v620_v24 = vsub.f32 1.0, %v619_v2  ;;  %v669_v28 = vand.u32 2147483648, %v2344_v9  ;;  %v772_v37 = vmul.f32 %v771_v16, %v2354_v21  ;;  %v2424_v38 = vmin.f32 %v795_v11, 16.0  ;;  %vm2438_vm1 = vmor %vm623_vm13, %vm624_vm14 }
 0x1d1   :  { %v660_v52 = vsub.f32 1.0, %v659_v58  ;;  %vm663_vm15 = vweird.f32 %v2344_v9  ;;  %vm664_vm0 = vweird.f32 %v2369_v39  ;;  %v736_v40 = vmul.f32 %v735_v15, %v2324_v35 }
 0x1d2   :  { %v621_v4 = vmul.f32 %v2359_v33, %v620_v24  ;;  %v685_v61 = vmul.f32 %v684_v60, %v2317_v25  ;;  %v723_v42 = vmul.f32 %v722_v19, %v2324_v35  ;;  %v760_v58 = vadd.f32 0.0036580483, %v759_v20  ;;  %vm2453_vm4 = vmor %vm663_vm15, %vm664_vm0 }
 0x1d3   :  { %v661_v14 = vmul.f32 %v2369_v39, %v660_v52  ;;  %v835_v43 = vmul.f32 %v2416_v22, %v2416_v22  ;;  %vm2442_vm2 = vcmp.eq.f32.partialorder %v627_v5, 8.507059e+37  ;;  %v630_v44 = vor.u32 1.1754944e-38, %v629_v10 }
 0x1d4   :  { %v2409_v13 = vpop.eup %2033  ;;  %v622_v29 = vadd.f32 %v2359_v33, %v621_v4  ;;  %vm2446_vm3 = vcmp.eq.f32.partialorder %v667_v27, 8.507059e+37  ;;  %v773_v23 = vadd.f32 0.112945676, %v772_v37  ;;  %v670_v48 = vor.u32 1.1754944e-38, %v669_v28  ;;  %v555_v28 = vpop.f32.mrf.mxu3 }
 0x1d5   :  { %v699_v17 = vmul.f32 %v2409_v13, %v2373_v41  ;;  %v662_v2 = vadd.f32 %v2369_v39, %v661_v14  ;;  %v797_v52 = vmul.f32 2.1237322e-06, %v2424_v38  ;;  %v2462_v32 = vadd.f32 1.0, %v736_v40 }
 0x1d6   :  { %v626_v46 = vsel %vm2438_vm1, %v2359_v33, %v622_v29  ;;  %v774_v3 = vmul.f32 %v773_v23, %v2354_v21  ;;  %v808_v6 = vmul.f32 3.8918573e-05, %v2424_v38  ;;  %v686_v33 = vadd.f32 1.1283791, %v685_v61 }
 0x1d7   :  { %v700_v30 = vsub.f32 1.0, %v699_v17  ;;  %v666_v53 = vsel %vm2453_vm4, %v2369_v39, %v662_v2  ;;  %v724_v56 = vadd.f32 0.18741608, %v723_v42  ;;  %v761_v45 = vmul.f32 %v760_v58, %v2354_v21 }
 0x1d8   :  { %v2467_v1 = vmin.f32 %v835_v43, 16.0  ;;  %v631_v4 = vsel %vm2442_vm2, %v630_v44, %v626_v46  ;;  %v709_v5 = vand.u32 2147483648, %v2373_v41  ;;  %v775_v10 = vadd.f32 0.4994258, %v774_v3 }
 0x1d9   :  { %v701_v24 = vmul.f32 %v2409_v13, %v700_v30  ;;  %v809_v11 = vadd.f32 0.001143296, %v808_v6  ;;  %v671_v39 = vsel %vm2446_vm3, %v670_v48, %v666_v53  ;;  %vm704_vm5 = vweird.f32 %v2409_v13 }
 0x1da   :  { %v798_v60 = vadd.f32 0.00028619796, %v797_v52  ;;  %2035 = vrcp.f32 %v2462_v32  ;;  %v776_v15 = vmul.f32 %v775_v10, %v2354_v21  ;;  %v837_v17 = vmul.f32 2.1237322e-06, %v2467_v1 }
 0x1db   :  { %v702_v14 = vadd.f32 %v2409_v13, %v701_v24  ;;  %v810_v16 = vmul.f32 %v809_v11, %v2424_v38  ;;  %vm703_vm6 = vweird.f32 %v2373_v41  ;;  %v707_v19 = vand.u32 2147483647, %v2373_v41 }
 0x1dc   :  { %v725_v20 = vmul.f32 %v724_v56, %v2324_v35  ;;  %v762_v27 = vadd.f32 0.05243302, %v761_v45  ;;  %v632_v29 = vmul.f32 %v631_v4, %v2400_v7  ;;  %vm2484_vm7 = vmor %vm703_vm6, %vm704_vm5  ;;  %v2488_v37 = vadd.f32 1.0, %v776_v15  ;;  %v501_v56 = vpop.f32.mrf.mxu0 }
 0x1dd   :  { %v811_v2 = vadd.f32 0.014752088, %v810_v16  ;;  %v848_v40 = vmul.f32 3.8918573e-05, %v2467_v1  ;;  %v672_v61 = vmul.f32 %v671_v39, %v647_v26  ;;  %v706_v41 = vsel %vm2484_vm7, %v2409_v13, %v702_v14 }
 0x1de   :  { %v799_v35 = vmul.f32 %v798_v60, %v2424_v38  ;;  %v838_v42 = vadd.f32 0.00028619796, %v837_v17  ;;  %v710_v58 = vor.u32 1.1754944e-38, %v709_v5  ;;  %2037 = vrcp.f32 %v2488_v37 }
 0x1df   :  { %v2497_v7 = vmul.f32 0.5, %v2397_v0  ;;  %v2500_v43 = vadd.f32 %v555_v28, %v2285_v63  ;;  %vm708_vm8 = vcmp.eq.f32.partialorder %v707_v19, 8.507059e+37  ;;  %v726_v59 = vadd.f32 1.1283791, %v725_v20 }
 0x1e0   :  { %v763_v26 = vmul.f32 %v762_v27, %v2354_v21  ;;  %v812_v9 = vmul.f32 %v811_v2, %v2424_v38  ;;  %v2504_v44 = vpop.eup %2035  ;;  %v1786_v13 = vclamps-f32 %v632_v29, 1.0  ;;  %v711_v25 = vsel %vm708_vm8, %v710_v58, %v706_v41 }
 0x1e1   :  { %v839_v23 = vmul.f32 %v838_v42, %v2467_v1  ;;  %v849_v46 = vadd.f32 0.001143296, %v848_v40  ;;  %v1787_v8 = vclamps-f32 %v672_v61, 1.0  ;;  %v687_v0 = vmul.f32 %v686_v33, %v2306_v12 }
 0x1e2   :  { %v800_v48 = vadd.f32 0.0036580483, %v799_v35  ;;  %v813_v24 = vadd.f32 0.112945676, %v812_v9  ;;  %v747_v52 = vand.u32 2147483647, %v2462_v32  ;;  %v739_v4 = vmul.f32 %v2504_v44, %v2462_v32 }
 0x1e3   :  { %v749_v53 = vand.u32 2147483648, %v2462_v32  ;;  %v850_v3 = vmul.f32 %v849_v46, %v2467_v1  ;;  %v2512_v6 = vmul.f32 0.70710677, %v2500_v43  ;;  %v712_v45 = vmul.f32 %v711_v25, %v687_v0  ;;  %v520_v25 = vpop.f32.mrf.mxu1 }
 0x1e4   :  { %v764_v5 = vadd.f32 0.18741608, %v763_v26  ;;  %v814_v10 = vmul.f32 %v813_v24, %v2424_v38  ;;  %v2517_v12 = vpop.eup %2037  ;;  %v2519_v33 = vadd.f32 1.0, %v1786_v13  ;;  %v840_v11 = vadd.f32 0.0036580483, %v839_v23 }
 0x1e5   :  { %v851_v39 = vadd.f32 0.014752088, %v850_v3  ;;  %v875_v14 = vmul.f32 %v2512_v6, %v2512_v6  ;;  %v2523_v60 = vadd.f32 1.0, %v1787_v8  ;;  %v779_v15 = vmul.f32 %v2517_v12, %v2488_v37 }
 0x1e6   :  { %v801_v16 = vmul.f32 %v800_v48, %v2424_v38  ;;  %v2529_v17 = vadd.f32 %v501_v56, %v2267_v54  ;;  %v2531_v19 = vor.u32 1.1754944e-38, %v749_v53  ;;  %v815_v20 = vadd.f32 0.4994258, %v814_v10 }
 0x1e7   :  { %v852_v27 = vmul.f32 %v851_v39, %v2467_v1  ;;  %v2534_v28 = vmin.f32 %v875_v14, 16.0  ;;  %v1788_v29 = vclamps-f32 %v712_v45, 1.0  ;;  %v740_v30 = vsub.f32 1.0, %v739_v4 }
 0x1e8   :  { %v765_v2 = vmul.f32 %v764_v5, %v2354_v21  ;;  %v780_v40 = vsub.f32 1.0, %v779_v15  ;;  %v816_v61 = vmul.f32 %v815_v20, %v2424_v38  ;;  %v841_v41 = vmul.f32 %v840_v11, %v2467_v1 }
 0x1e9   :  { %v853_v35 = vadd.f32 0.112945676, %v852_v27  ;;  %v877_v42 = vmul.f32 2.1237322e-06, %v2534_v28  ;;  %v2541_v58 = vmul.f32 %v726_v59, %v2311_v18  ;;  %v802_v26 = vadd.f32 0.05243302, %v801_v16 }
 0x1ea   :  { %v888_v9 = vmul.f32 3.8918573e-05, %v2534_v28  ;;  %v2545_v13 = vmul.f32 0.70710677, %v2529_v17  ;;  %vm744_vm9 = vweird.f32 %v2504_v44  ;;  %v2548_v21 = vadd.f32 1.0, %v816_v61 }
 0x1eb   :  { %v854_v23 = vmul.f32 %v853_v35, %v2467_v1  ;;  %v878_v46 = vadd.f32 0.00028619796, %v877_v42  ;;  %v2551_v8 = vadd.f32 1.0, %v1788_v29  ;;  %vm743_vm10 = vweird.f32 %v2462_v32  ;;  %v539_v35 = vpop.f32.mrf.mxu2  ;;  %v1971_v42 = vld [vmem:[#allocation9 + $0x38] sm:$0xff] }
 0x1ec   :  { %v766_v18 = vadd.f32 1.1283791, %v765_v2  ;;  %v781_v59 = vmul.f32 %v2517_v12, %v780_v40  ;;  %v889_v0 = vadd.f32 0.001143296, %v888_v9  ;;  %2039 = vrcp.f32 %v2548_v21  ;;  %1535 = vmatpush.bf16.msrb.mxu0 %v1971_v42  ;;  %vm2616_vm0 = vmor %vm743_vm10, %vm744_vm9 }
 0x1ed   :  { %v842_v48 = vadd.f32 0.05243302, %v841_v41  ;;  %v915_v24 = vmul.f32 %v2545_v13, %v2545_v13  ;;  %v2559_v53 = vadd.f32 %v520_v25, %v2269_v55  ;;  %v741_v3 = vmul.f32 %v2504_v44, %v740_v30 }
 0x1ee   :  { %v803_v56 = vmul.f32 %v802_v26, %v2424_v38  ;;  %v855_v45 = vadd.f32 0.4994258, %v854_v23  ;;  %v879_v4 = vmul.f32 %v878_v46, %v2534_v28  ;;  %vm783_vm11 = vweird.f32 %v2488_v37  ;;  %v1979_v26 = vld [vmem:[#allocation9 + $0x78] sm:$0xff] }
 0x1ef   :  { %v787_v5 = vand.u32 2147483647, %v2488_v37  ;;  %v789_v10 = vand.u32 2147483648, %v2488_v37  ;;  %v890_v11 = vmul.f32 %v889_v0, %v2534_v28  ;;  %v782_v39 = vadd.f32 %v2517_v12, %v781_v59  ;;  %1554 = vmatpush.bf16.msrb.mxu1 %v1979_v26 }
 0x1f0   :  { %vm784_vm12 = vweird.f32 %v2517_v12  ;;  %v856_v14 = vmul.f32 %v855_v45, %v2467_v1  ;;  %v880_v15 = vadd.f32 0.0036580483, %v879_v4  ;;  %v843_v16 = vmul.f32 %v842_v48, %v2467_v1 }
 0x1f1   :  { %v891_v20 = vadd.f32 0.014752088, %v890_v11  ;;  %v2572_v27 = vmin.f32 %v915_v24, 16.0  ;;  %v2575_v29 = vmul.f32 0.70710677, %v2559_v53  ;;  %v742_v30 = vadd.f32 %v2504_v44, %v741_v3  ;;  %vm2594_vm14 = vmor %vm783_vm11, %vm784_vm12  ;;  %v1970_v11 = vld [vmem:[#allocation9 + $0x30] sm:$0xff] }
 0x1f2   :  { %vm2580_vm13 = vcmp.eq.f32.partialorder %v747_v52, 8.507059e+37  ;;  %v804_v40 = vadd.f32 0.18741608, %v803_v56  ;;  %v2584_v61 = vadd.f32 1.0, %v856_v14  ;;  %v881_v41 = vmul.f32 %v880_v15, %v2534_v28  ;;  %v2587_v9 = vpop.eup %2039  ;;  %v1978_v14 = vld [vmem:[#allocation9 + $0x70] sm:$0xff]  ;;  %1536 = vmatpush.bf16.msrb.mxu0 %v1970_v11 }
 0x1f3   :  { %v767_v25 = vmul.f32 %v766_v18, %v2336_v31  ;;  %vm2598_vm15 = vcmp.eq.f32.partialorder %v787_v5, 8.507059e+37  ;;  %v892_v46 = vmul.f32 %v891_v20, %v2534_v28  ;;  %v955_v59 = vmul.f32 %v2575_v29, %v2575_v29  ;;  %v1987_v20 = vld [vmem:[#allocation9 + $0xb8] sm:$0xff]  ;;  %1555 = vmatpush.bf16.msrb.mxu1 %v1978_v14  ;;  %v1968_v14 = vld [vmem:[#allocation9 + $0x20] sm:$0xff] }
 0x1f4   :  { %v786_v31 = vsel %vm2594_vm14, %v2517_v12, %v782_v39  ;;  %v819_v37 = vmul.f32 %v2587_v9, %v2548_v21  ;;  %2041 = vrcp.f32 %v2584_v61  ;;  %v917_v18 = vmul.f32 2.1237322e-06, %v2572_v27  ;;  %1573 = vmatpush.bf16.msrb.mxu2 %v1987_v20  ;;  %v1976_v20 = vld [vmem:[#allocation9 + $0x60] sm:$0xff] }
 0x1f5   :  { %v790_v48 = vor.u32 1.1754944e-38, %v789_v10  ;;  %v844_v24 = vadd.f32 0.18741608, %v843_v16  ;;  %v882_v12 = vadd.f32 0.05243302, %v881_v41  ;;  %v2621_v3 = vadd.f32 %v539_v35, %v2283_v62 }
 0x1f6   :  { %v746_v56 = vsel %vm2616_vm0, %v2504_v44, %v742_v30  ;;  %v805_v45 = vmul.f32 %v804_v40, %v2424_v38  ;;  %v820_v4 = vsub.f32 1.0, %v819_v37  ;;  %v893_v5 = vadd.f32 0.112945676, %v892_v46  ;;  %v1995_v30 = vld [vmem:[#allocation9 + $0xf8] sm:$0xff] }
 0x1f7   :  { %v791_v32 = vsel %vm2598_vm15, %v790_v48, %v786_v31  ;;  %vm824_vm1 = vweird.f32 %v2587_v9  ;;  %v827_v10 = vand.u32 2147483647, %v2548_v21  ;;  %v2631_v39 = vmin.f32 %v955_v59, 16.0  ;;  %1592 = vmatpush.bf16.msrb.mxu3 %v1995_v30  ;;  %v1969_v59 = vld [vmem:[#allocation9 + $0x28] sm:$0xff] }
 0x1f8   :  { %v821_v15 = vmul.f32 %v2587_v9, %v820_v4  ;;  %v883_v16 = vmul.f32 %v882_v12, %v2534_v28  ;;  %v894_v44 = vmul.f32 %v893_v5, %v2534_v28  ;;  %v918_v38 = vadd.f32 0.00028619796, %v917_v18  ;;  %v1977_v31 = vld [vmem:[#allocation9 + $0x68] sm:$0xff]  ;;  %1537 = vmatpush.bf16.msrb.mxu0 %v1969_v59  ;;  %v1994_v12 = vld [vmem:[#allocation9 + $0xf0] sm:$0xff]  ;;  %v1967_v18 = vld [vmem:[#allocation9 + $0x18] sm:$0xff] }
 0x1f9   :  { %vm823_vm2 = vweird.f32 %v2548_v21  ;;  %v829_v40 = vand.u32 2147483648, %v2548_v21  ;;  %v845_v41 = vmul.f32 %v844_v24, %v2467_v1  ;;  %v2640_v35 = vmul.f32 0.70710677, %v2621_v3  ;;  %v1986_v24 = vld [vmem:[#allocation9 + $0xb0] sm:$0xff]  ;;  %1556 = vmatpush.bf16.msrb.mxu1 %v1977_v31 }
 0x1fa   :  { %v2642_v42 = vpop.eup %2041  ;;  %v792_v26 = vmul.f32 %v791_v32, %v767_v25  ;;  %v822_v52 = vadd.f32 %v2587_v9, %v821_v15  ;;  %v895_v23 = vadd.f32 0.4994258, %v894_v44  ;;  %v957_v46 = vmul.f32 2.1237322e-06, %v2631_v39  ;;  %vm2653_vm3 = vmor %vm823_vm2, %vm824_vm1  ;;  %1574 = vmatpush.bf16.msrb.mxu2 %v1986_v24  ;;  %v558_v25 = vpop.f32.mrf.mxu3  ;;  %v1984_v24 = vld [vmem:[#allocation9 + $0xa0] sm:$0xff] }
 0x1fb   :  { %v751_v1 = vsel %vm2580_vm13, %v2531_v19, %v746_v56  ;;  %v806_v37 = vadd.f32 1.1283791, %v805_v45  ;;  %vm2657_vm4 = vcmp.eq.f32.partialorder %v827_v10, 8.507059e+37  ;;  %v859_v0 = vmul.f32 %v2642_v42, %v2584_v61  ;;  %1593 = vmatpush.bf16.msrb.mxu3 %v1994_v12  ;;  %v1992_v12 = vld [vmem:[#allocation9 + $0xe0] sm:$0xff] }
 0x1fc   :  { %v826_v19 = vsel %vm2653_vm3, %v2587_v9, %v822_v52  ;;  %v884_v2 = vadd.f32 0.18741608, %v883_v16  ;;  %v896_v48 = vmul.f32 %v895_v23, %v2534_v28  ;;  %v919_v21 = vmul.f32 %v918_v38, %v2572_v27  ;;  %v503_v38 = vpop.f32.mrf.mxu0  ;;  %1538 = vmatpush.bf16.msrb.mxu0 %v1968_v14  ;;  %v1993_v52 = vld [vmem:[#allocation9 + $0xe8] sm:$0xff] }
 0x1fd   :  { %v830_v56 = vor.u32 1.1754944e-38, %v829_v40  ;;  %v846_v45 = vadd.f32 1.1283791, %v845_v41  ;;  %v860_v4 = vsub.f32 1.0, %v859_v0  ;;  %v995_v5 = vmul.f32 %v2640_v35, %v2640_v35  ;;  %1557 = vmatpush.bf16.msrb.mxu1 %v1976_v20 }
 0x1fe   :  { %v1790_v11 = vclamps-f32 %v792_v26, 1.0  ;;  %v869_v32 = vand.u32 2147483648, %v2584_v61  ;;  %v2671_v10 = vadd.f32 1.0, %v896_v48  ;;  %v958_v9 = vadd.f32 0.00028619796, %v957_v46  ;;  %v1985_v26 = vld [vmem:[#allocation9 + $0xa8] sm:$0xff] }
 0x1ff   :  { %v831_v15 = vsel %vm2657_vm4, %v830_v56, %v826_v19  ;;  %v861_v16 = vmul.f32 %v2642_v42, %v860_v4  ;;  %vm864_vm5 = vweird.f32 %v2642_v42  ;;  %v867_v44 = vand.u32 2147483647, %v2584_v61  ;;  %1575 = vmatpush.bf16.msrb.mxu2 %v1985_v26  ;;  %1594 = vmatpush.bf16.msrb.mxu3 %v1993_v52 }
 0x200   :  { %v807_v30 = vmul.f32 %v806_v37, %v2389_v51  ;;  %v885_v40 = vmul.f32 %v884_v2, %v2534_v28  ;;  %2043 = vrcp.f32 %v2671_v10  ;;  %v920_v41 = vadd.f32 0.0036580483, %v919_v21  ;;  %v1975_v21 = vld [vmem:[#allocation9 + $0x58] sm:$0xff]  ;;  %1539 = vmatpush.bf16.msrb.mxu0 %v1967_v18  ;;  %v1982_v18 = vld [vmem:[#allocation9 + $0x90] sm:$0xff] }
 0x201   :  { %v2682_v23 = vmul.f32 %v751_v1, %v2541_v58  ;;  %v862_v46 = vadd.f32 %v2642_v42, %v861_v16  ;;  %vm863_vm6 = vweird.f32 %v2584_v61  ;;  %v2686_v59 = vmin.f32 %v995_v5, 16.0  ;;  %1558 = vmatpush.bf16.msrb.mxu1 %v1975_v21 }
 0x202   :  { %v832_v31 = vmul.f32 %v831_v15, %v807_v30  ;;  %vm865_vm7 = vmor %vm863_vm6, %vm864_vm5  ;;  %v870_v51 = vor.u32 1.1754944e-38, %v869_v32  ;;  %v959_v28 = vmul.f32 %v958_v9, %v2631_v39  ;;  %v2692_v37 = vadd.f32 %v503_v38, %v2267_v54  ;;  %v522_v54 = vpop.f32.mrf.mxu1  ;;  %v1991_v38 = vld [vmem:[#allocation9 + $0xd8] sm:$0xff]  ;;  %v560_v21 = vpop.f32.mrf.mxu3 }
 0x203   :  { %v1239_v58 = vadd.f32 1.0, %v1790_v11  ;;  %v847_v1 = vmul.f32 %v846_v45, %v2416_v22  ;;  %v866_v61 = vsel %vm865_vm7, %v2642_v42, %v862_v46  ;;  %vm868_vm8 = vcmp.eq.f32.partialorder %v867_v44, 8.507059e+37  ;;  %1576 = vmatpush.bf16.msrb.mxu2 %v1984_v24  ;;  %1595 = vmatpush.bf16.msrb.mxu3 %v1992_v12  ;;  %v541_v44 = vpop.f32.mrf.mxu2  ;;  %v1965_v46 = vld [vmem:[#allocation9 + $0x8] sm:$0xff] }
 0x204   :  { %v2698_v0 = vmul.f32 %v2519_v33, %v2362_v34  ;;  %v871_v19 = vsel %vm868_vm8, %v870_v51, %v866_v61  ;;  %v886_v2 = vadd.f32 1.1283791, %v885_v40  ;;  %v921_v48 = vmul.f32 %v920_v41, %v2572_v27 }
 0x205   :  { %v2703_v22 = vmul.f32 %v2523_v60, %v2365_v36  ;;  %v872_v42 = vmul.f32 %v871_v19, %v847_v1  ;;  %v2706_v56 = vmul.f32 0.5, %v2500_v43  ;;  %v997_v45 = vmul.f32 2.1237322e-06, %v2686_v59  ;;  %v1966_v36 = vld [vmem:[#allocation9 + $0x10] sm:$0xff] }
 0x206   :  { %v2709_v34 = vpop.eup %2043  ;;  %v2713_v33 = vmul.f32 %v2551_v8, %v2381_v47  ;;  %v1791_v4 = vclamps-f32 %v832_v31, 1.0  ;;  %v960_v5 = vadd.f32 0.0036580483, %v959_v28  ;;  %v2716_v11 = vmul.f32 0.70710677, %v2692_v37  ;;  %v1974_v47 = vld [vmem:[#allocation9 + $0x50] sm:$0xff]  ;;  %1540 = vmatpush.bf16.msrb.mxu0 %v1966_v36 }
 0x207   :  { %v1789_v43 = vclamps-f32 %v2682_v23, 1.0  ;;  %v2720_v60 = vmul.f32 %v1239_v58, %v2387_v50  ;;  %v899_v32 = vmul.f32 %v2709_v34, %v2671_v10  ;;  %v2725_v9 = vadd.f32 %v522_v54, %v2269_v55  ;;  %v1983_v50 = vld [vmem:[#allocation9 + $0x98] sm:$0xff]  ;;  %1559 = vmatpush.bf16.msrb.mxu1 %v1974_v47  ;;  %1596 = vmatpush.bf16.msrb.mxu3 %v1991_v38  ;;  %v1973_v58 = vld [vmem:[#allocation9 + $0x48] sm:$0xff]  ;;  %v1990_v19 = vld [vmem:[#allocation9 + $0xd0] sm:$0xff] }
 0x208   :  { %v887_v8 = vmul.f32 %v886_v2, %v2512_v6  ;;  %v922_v14 = vadd.f32 0.05243302, %v921_v48  ;;  %v2729_v15 = vadd.f32 %v558_v25, %v2285_v63  ;;  %v1075_v16 = vmul.f32 %v2716_v11, %v2716_v11  ;;  %1577 = vmatpush.bf16.msrb.mxu2 %v1983_v50  ;;  %v1972_v47 = vld [vmem:[#allocation9 + $0x40] sm:$0xff]  ;;  %v1989_v38 = vld [vmem:[#allocation9 + $0xc8] sm:$0xff] }
 0x209   :  { %v1792_v20 = vclamps-f32 %v872_v42, 1.0  ;;  %v900_v30 = vsub.f32 1.0, %v899_v32  ;;  %v907_v40 = vand.u32 2147483647, %v2671_v10  ;;  %v909_v55 = vand.u32 2147483648, %v2671_v10  ;;  %v1964_v32 = vld [vmem:[#allocation9] sm:$0xff] }
 0x20a   :  { %v1240_v41 = vadd.f32 1.0, %v1791_v4  ;;  %v961_v6 = vmul.f32 %v960_v5, %v2631_v39  ;;  %v998_v26 = vadd.f32 0.00028619796, %v997_v45  ;;  %v2736_v52 = vmin.f32 %v1075_v16, 16.0  ;;  %1541 = vmatpush.bf16.msrb.mxu0 %v1965_v46 }
 0x20b   :  { %v901_v31 = vmul.f32 %v2709_v34, %v900_v30  ;;  %vm904_vm9 = vweird.f32 %v2709_v34  ;;  %v2741_v51 = vmul.f32 0.70710677, %v2725_v9  ;;  %v2744_v28 = vadd.f32 %v541_v44, %v2283_v62  ;;  %1560 = vmatpush.bf16.msrb.mxu1 %v1973_v58  ;;  %1597 = vmatpush.bf16.msrb.mxu3 %v1990_v19  ;;  %v1988_v58 = vld [vmem:[#allocation9 + $0xc0] sm:$0xff] }
 0x20c   :  { %vm903_vm10 = vweird.f32 %v2671_v10  ;;  %v923_v1 = vmul.f32 %v922_v14, %v2572_v27  ;;  %v2749_v61 = vmul.f32 0.70710677, %v2729_v15  ;;  %v1077_v25 = vmul.f32 2.1237322e-06, %v2736_v52  ;;  %1578 = vmatpush.bf16.msrb.mxu2 %v1982_v18  ;;  %v1981_v14 = vld [vmem:[#allocation9 + $0x88] sm:$0xff] }
 0x20d   :  { %v1241_v2 = vadd.f32 1.0, %v1792_v20  ;;  %v902_v48 = vadd.f32 %v2709_v34, %v901_v31  ;;  %v1115_v62 = vmul.f32 %v2741_v51, %v2741_v51  ;;  %v2756_v54 = vmul.f32 0.70710677, %v2744_v28  ;;  %vm2760_vm11 = vmor %vm903_vm10, %vm904_vm9 }
 0x20e   :  { %vm908_vm12 = vcmp.eq.f32.partialorder %v907_v40, 8.507059e+37  ;;  %v910_v24 = vor.u32 1.1754944e-38, %v909_v55  ;;  %v962_v12 = vadd.f32 0.05243302, %v961_v6  ;;  %v1078_v42 = vadd.f32 0.00028619796, %v1077_v25  ;;  %1542 = vmatpush.bf16.msrb.mxu0 %v1964_v32 }
 0x20f   :  { %v1256_v45 = vmul.f32 %v1240_v41, %v2394_v57  ;;  %v906_v4 = vsel %vm2760_vm11, %v2709_v34, %v902_v48  ;;  %v2768_v5 = vmin.f32 %v1115_v62, 16.0  ;;  %v1155_v36 = vmul.f32 %v2756_v54, %v2756_v54  ;;  %1561 = vmatpush.bf16.msrb.mxu1 %v1972_v47  ;;  %1598 = vmatpush.bf16.msrb.mxu3 %v1989_v38 }
 0x210   :  { %v911_v16 = vsel %vm908_vm12, %v910_v24, %v906_v4  ;;  %v999_v44 = vmul.f32 %v998_v26, %v2686_v59  ;;  %v1079_v50 = vmul.f32 %v1078_v42, %v2736_v52  ;;  %v2775_v57 = vadd.f32 %v560_v21, %v2285_v63  ;;  %1579 = vmatpush.bf16.msrb.mxu2 %v1981_v14  ;;  %v1980_v26 = vld [vmem:[#allocation9 + $0x80] sm:$0xff] }
 0x211   :  { %v1257_v34 = vmul.f32 %v1241_v2, %v2497_v7  ;;  %v912_v20 = vmul.f32 %v911_v16, %v887_v8  ;;  %v1117_v30 = vmul.f32 2.1237322e-06, %v2768_v5  ;;  %v2779_v40 = vmin.f32 %v1155_v36, 16.0 }
 0x212   :  { %v1238_v55 = vadd.f32 1.0, %v1789_v43  ;;  %v1035_v41 = vmul.f32 %v2749_v61, %v2749_v61  ;;  %v1080_v6 = vadd.f32 0.0036580483, %v1079_v50  ;;  %v1271_v63 = vpack.c.bf16 %v2720_v60, %v2698_v0 }
 0x213   :  { %v1793_v7 = vclamps-f32 %v912_v20, 1.0  ;;  %v1118_v8 = vadd.f32 0.00028619796, %v1117_v30  ;;  %v1157_v46 = vmul.f32 2.1237322e-06, %v2779_v40  ;;  %v1272_v31 = vpack.c.bf16 %v1256_v45, %v2703_v22  ;;  %1599 = vmatpush.bf16.msrb.mxu3 %v1988_v58 }
 0x214   :  { %v924_v23 = vadd.f32 0.18741608, %v923_v1  ;;  %v963_v43 = vmul.f32 %v962_v12, %v2631_v39  ;;  %v1081_v25 = vmul.f32 %v1080_v6, %v2736_v52  ;;  %v2792_v18 = vmul.f32 0.70710677, %v2775_v57  ;;  %1543 = vmatmul.bf16.vlgmr.msrb.gmra.mxu0 %v1271_v63  ;;  %1580 = vmatpush.bf16.msrb.mxu2 %v1980_v26 }
 0x215   :  { %v1242_v19 = vadd.f32 1.0, %v1793_v7  ;;  %v1000_v0 = vadd.f32 0.0036580483, %v999_v44  ;;  %v1119_v60 = vmul.f32 %v1118_v8, %v2768_v5  ;;  %1562 = vmatmul.bf16.vlgmr.msrb.gmra.mxu1 %v1272_v31  ;;  %v1273_v2 = vpack.c.bf16 %v1257_v34, %v2713_v33 }
 0x216   :  { %v1254_v48 = vmul.f32 %v1238_v55, %v2385_v49  ;;  %v2797_v22 = vmin.f32 %v1035_v41, 16.0  ;;  %v1158_v1 = vadd.f32 0.00028619796, %v1157_v46  ;;  %v928_v62 = vmul.f32 3.8918573e-05, %v2572_v27 }
 0x217   :  { %v1258_v21 = vmul.f32 %v1242_v19, %v2706_v56  ;;  %v1082_v10 = vadd.f32 0.05243302, %v1081_v25  ;;  %v1120_v24 = vadd.f32 0.0036580483, %v1119_v60  ;;  %v1088_v12 = vmul.f32 3.8918573e-05, %v2736_v52  ;;  %1581 = vmatmul.bf16.vlgmr.msrb.gmra.mxu2 %v1273_v2 }
 0x218   :  { %v925_v42 = vmul.f32 %v924_v23, %v2572_v27  ;;  %v964_v45 = vadd.f32 0.18741608, %v963_v43  ;;  %v1195_v33 = vmul.f32 %v2792_v18, %v2792_v18  ;;  %v929_v49 = vadd.f32 0.001143296, %v928_v62 }
 0x219   :  { %v1001_v4 = vmul.f32 %v1000_v0, %v2686_v59  ;;  %v1121_v36 = vmul.f32 %v1120_v24, %v2768_v5  ;;  %v1274_v32 = vpack.c.bf16 %v1258_v21, %v1254_v48  ;;  %v1089_v47 = vadd.f32 0.001143296, %v1088_v12 }
 0x21a   :  { %v2808_v56 = vmul.f32 0.5, %v2529_v17  ;;  %v1037_v14 = vmul.f32 2.1237322e-06, %v2797_v22  ;;  %v1159_v16 = vmul.f32 %v1158_v1, %v2779_v40  ;;  %v930_v44 = vmul.f32 %v929_v49, %v2572_v27 }
 0x21b   :  { %v1083_v50 = vmul.f32 %v1082_v10, %v2736_v52  ;;  %v1122_v38 = vadd.f32 0.05243302, %v1121_v36  ;;  %1600 = vmatmul.bf16.vlgmr.msrb.gmra.mxu3 %v1274_v32  ;;  %v1090_v34 = vmul.f32 %v1089_v47, %v2736_v52  ;;  %v968_v20 = vmul.f32 3.8918573e-05, %v2631_v39 }
 0x21c   :  { %v926_v30 = vadd.f32 1.1283791, %v925_v42  ;;  %v2817_v55 = vmul.f32 0.5, %v2559_v53  ;;  %v2819_v17 = vmin.f32 %v1195_v33, 16.0  ;;  %v931_v41 = vadd.f32 0.014752088, %v930_v44 }
 0x21d   :  { %v965_v6 = vmul.f32 %v964_v45, %v2631_v39  ;;  %v1002_v63 = vadd.f32 0.05243302, %v1001_v4  ;;  %v1091_v26 = vadd.f32 0.014752088, %v1090_v34  ;;  %v969_v7 = vadd.f32 0.001143296, %v968_v20 }
 0x21e   :  { %v1038_v8 = vadd.f32 0.00028619796, %v1037_v14  ;;  %v1123_v46 = vmul.f32 %v1122_v38, %v2768_v5  ;;  %v932_v31 = vmul.f32 %v931_v41, %v2572_v27  ;;  %v1128_v58 = vmul.f32 3.8918573e-05, %v2768_v5 }
 0x21f   :  { %v1084_v23 = vadd.f32 0.18741608, %v1083_v50  ;;  %v1160_v43 = vadd.f32 0.0036580483, %v1159_v16  ;;  %v1092_v53 = vmul.f32 %v1091_v26, %v2736_v52  ;;  %v970_v25 = vmul.f32 %v969_v7, %v2631_v39 }
 0x220   :  { %v1197_v19 = vmul.f32 2.1237322e-06, %v2819_v17  ;;  %v933_v0 = vadd.f32 0.112945676, %v932_v31  ;;  %v1129_v60 = vadd.f32 0.001143296, %v1128_v58  ;;  %v1003_v48 = vmul.f32 %v1002_v63, %v2686_v59 }
 0x221   :  { %v966_v2 = vadd.f32 1.1283791, %v965_v6  ;;  %v1093_v1 = vadd.f32 0.112945676, %v1092_v53  ;;  %v971_v62 = vadd.f32 0.014752088, %v970_v25  ;;  %v1039_v42 = vmul.f32 %v1038_v8, %v2797_v22 }
 0x222   :  { %v1124_v21 = vadd.f32 0.18741608, %v1123_v46  ;;  %v934_v10 = vmul.f32 %v933_v0, %v2572_v27  ;;  %v1130_v24 = vmul.f32 %v1129_v60, %v2768_v5  ;;  %v1008_v12 = vmul.f32 3.8918573e-05, %v2686_v59 }
 0x223   :  { %v1161_v45 = vmul.f32 %v1160_v43, %v2779_v40  ;;  %v1094_v33 = vmul.f32 %v1093_v1, %v2736_v52  ;;  %v972_v49 = vmul.f32 %v971_v62, %v2631_v39  ;;  %v1085_v4 = vmul.f32 %v1084_v23, %v2736_v52 }
 0x224   :  { %v1198_v36 = vadd.f32 0.00028619796, %v1197_v19  ;;  %v935_v32 = vadd.f32 0.4994258, %v934_v10  ;;  %v1131_v47 = vadd.f32 0.014752088, %v1130_v24  ;;  %v1125_v50 = vmul.f32 %v1124_v21, %v2768_v5 }
 0x225   :  { %v1004_v14 = vadd.f32 0.18741608, %v1003_v48  ;;  %v1095_v16 = vadd.f32 0.4994258, %v1094_v33  ;;  %v973_v44 = vadd.f32 0.112945676, %v972_v49  ;;  %v2850_v53 = vmul.f32 %v926_v30, %v2545_v13 }
 0x226   :  { %v936_v38 = vmul.f32 %v935_v32, %v2572_v27  ;;  %v1132_v34 = vmul.f32 %v1131_v47, %v2768_v5  ;;  %v1009_v20 = vadd.f32 0.001143296, %v1008_v12  ;;  %v1040_v41 = vadd.f32 0.0036580483, %v1039_v42 }
 0x227   :  { %v1096_v6 = vmul.f32 %v1095_v16, %v2736_v52  ;;  %v974_v63 = vmul.f32 %v973_v44, %v2631_v39  ;;  %v1168_v26 = vmul.f32 3.8918573e-05, %v2779_v40  ;;  %v1086_v7 = vadd.f32 1.1283791, %v1085_v4 }
 0x228   :  { %v1162_v8 = vadd.f32 0.05243302, %v1161_v45  ;;  %v1199_v46 = vmul.f32 %v1198_v36, %v2819_v17  ;;  %v2844_v31 = vadd.f32 1.0, %v936_v38  ;;  %v1133_v27 = vadd.f32 0.112945676, %v1132_v34 }
 0x229   :  { %v2846_v58 = vadd.f32 1.0, %v1096_v6  ;;  %v975_v23 = vadd.f32 0.4994258, %v974_v63  ;;  %v1010_v43 = vmul.f32 %v1009_v20, %v2686_v59  ;;  %v2853_v52 = vmul.f32 0.5, %v2692_v37 }
 0x22a   :  { %v1126_v25 = vadd.f32 1.1283791, %v1125_v50  ;;  %2045 = vrcp.f32 %v2844_v31  ;;  %v2857_v19 = vmul.f32 %v966_v2, %v2575_v29  ;;  %v2860_v0 = vmul.f32 0.5, %v2725_v9 }
 0x22b   :  { %2047 = vrcp.f32 %v2846_v58  ;;  %v1169_v60 = vadd.f32 0.001143296, %v1168_v26  ;;  %v2864_v48 = vmul.f32 %v1004_v14, %v2686_v59  ;;  %v2867_v13 = vmul.f32 %v1040_v41, %v2797_v22 }
 0x22c   :  { %v2870_v37 = vmul.f32 %v1162_v8, %v2779_v40  ;;  %v976_v30 = vmul.f32 %v975_v23, %v2631_v39  ;;  %v2874_v29 = vmul.f32 %v1086_v7, %v2716_v11  ;;  %v2876_v2 = vadd.f32 0.0036580483, %v1199_v46 }
 0x22d   :  { %v1134_v9 = vmul.f32 %v1133_v27, %v2768_v5  ;;  %v1011_v1 = vadd.f32 0.014752088, %v1010_v43  ;;  %v2880_v62 = vmul.f32 %v1126_v25, %v2741_v51  ;;  %v947_v21 = vand.u32 2147483647, %v2844_v31 }
 0x22e   :  { %v949_v10 = vand.u32 2147483648, %v2844_v31  ;;  %v2884_v24 = vadd.f32 1.0, %v976_v30  ;;  %vm943_vm13 = vweird.f32 %v2844_v31  ;;  %v1170_v12 = vmul.f32 %v1169_v60, %v2779_v40 }
 0x22f   :  { %v1135_v39 = vadd.f32 0.4994258, %v1134_v9  ;;  %v1012_v11 = vmul.f32 %v1011_v1, %v2686_v59  ;;  %vm1103_vm14 = vweird.f32 %v2846_v58  ;;  %v1107_v45 = vand.u32 2147483647, %v2846_v58 }
 0x230   :  { %v2046_v42 = vpop.eup %2045  ;;  %v1109_v51 = vand.u32 2147483648, %v2846_v58  ;;  %2049 = vrcp.f32 %v2884_v24  ;;  %v1048_v32 = vmul.f32 3.8918573e-05, %v2797_v22  ;;  %vm2896_vm15 = vcmp.eq.f32.partialorder %v947_v21, 8.507059e+37 }
 0x231   :  { %v2048_v33 = vpop.eup %2047  ;;  %v939_v49 = vmul.f32 %v2046_v42, %v2844_v31  ;;  %v1136_v4 = vmul.f32 %v1135_v39, %v2768_v5  ;;  %v1013_v36 = vadd.f32 0.112945676, %v1012_v11  ;;  %v950_v14 = vor.u32 1.1754944e-38, %v949_v10 }
 0x232   :  { %v1099_v16 = vmul.f32 %v2048_v33, %v2846_v58  ;;  %v987_v44 = vand.u32 2147483647, %v2884_v24  ;;  %v1171_v20 = vadd.f32 0.014752088, %v1170_v12  ;;  %vm2905_vm0 = vcmp.eq.f32.partialorder %v1107_v45, 8.507059e+37 }
 0x233   :  { %v940_v50 = vsub.f32 1.0, %v939_v49  ;;  %v2902_v38 = vadd.f32 1.0, %v1136_v4  ;;  %v1014_v34 = vmul.f32 %v1013_v36, %v2686_v59  ;;  %v1110_v6 = vor.u32 1.1754944e-38, %v1109_v51 }
 0x234   :  { %v1100_v41 = vsub.f32 1.0, %v1099_v16  ;;  %v1208_v63 = vmul.f32 3.8918573e-05, %v2819_v17  ;;  %vm944_vm1 = vweird.f32 %v2046_v42  ;;  %vm983_vm2 = vweird.f32 %v2884_v24 }
 0x235   :  { %v941_v26 = vmul.f32 %v2046_v42, %v940_v50  ;;  %2051 = vrcp.f32 %v2902_v38  ;;  %v1049_v7 = vadd.f32 0.001143296, %v1048_v32  ;;  %vm1104_vm3 = vweird.f32 %v2048_v33  ;;  %vm945_vm5 = vmor %vm943_vm13, %vm944_vm1 }
 0x236   :  { %v2050_v8 = vpop.eup %2049  ;;  %v1101_v46 = vmul.f32 %v2048_v33, %v1100_v41  ;;  %v1015_v23 = vadd.f32 0.4994258, %v1014_v34  ;;  %v1172_v27 = vmul.f32 %v1171_v20, %v2779_v40  ;;  %vm2914_vm4 = vcmp.eq.f32.partialorder %v987_v44, 8.507059e+37  ;;  %vm1105_vm6 = vmor %vm1103_vm14, %vm1104_vm3 }
 0x237   :  { %v942_v43 = vadd.f32 %v2046_v42, %v941_v26  ;;  %v979_v25 = vmul.f32 %v2050_v8, %v2884_v24  ;;  %v989_v30 = vand.u32 2147483648, %v2884_v24  ;;  %v1209_v10 = vadd.f32 0.001143296, %v1208_v63 }
 0x238   :  { %v1102_v9 = vadd.f32 %v2048_v33, %v1101_v46  ;;  %v1016_v1 = vmul.f32 %v1015_v23, %v2686_v59  ;;  %v1173_v21 = vadd.f32 0.112945676, %v1172_v27  ;;  %vm984_vm7 = vweird.f32 %v2050_v8 }
 0x239   :  { %v946_v39 = vsel %vm945_vm5, %v2046_v42, %v942_v43  ;;  %v980_v11 = vsub.f32 1.0, %v979_v25  ;;  %v1050_v12 = vmul.f32 %v1049_v7, %v2797_v22  ;;  %v990_v16 = vor.u32 1.1754944e-38, %v989_v30  ;;  %vm985_vm9 = vmor %vm983_vm2, %vm984_vm7 }
 0x23a   :  { %v951_v45 = vsel %vm2896_vm15, %v950_v14, %v946_v39  ;;  %v1106_v51 = vsel %vm1105_vm6, %v2048_v33, %v1102_v9  ;;  %v2927_v49 = vadd.f32 1.0, %v1016_v1  ;;  %v1174_v31 = vmul.f32 %v1173_v21, %v2779_v40 }
 0x23b   :  { %v2052_v4 = vpop.eup %2051  ;;  %v952_v59 = vmul.f32 %v951_v45, %v2850_v53  ;;  %v1111_v42 = vsel %vm2905_vm0, %v1110_v6, %v1106_v51  ;;  %v981_v58 = vmul.f32 %v2050_v8, %v980_v11  ;;  %v1051_v36 = vadd.f32 0.014752088, %v1050_v12 }
 0x23c   :  { %v1112_v32 = vmul.f32 %v1111_v42, %v2874_v29  ;;  %v1139_v44 = vmul.f32 %v2052_v4, %v2902_v38  ;;  %2053 = vrcp.f32 %v2927_v49  ;;  %vm1143_vm8 = vweird.f32 %v2902_v38 }
 0x23d   :  { %v1794_v33 = vclamps-f32 %v952_v59, 1.0  ;;  %v982_v47 = vadd.f32 %v2050_v8, %v981_v58  ;;  %v1147_v14 = vand.u32 2147483647, %v2902_v38  ;;  %v1175_v34 = vadd.f32 0.4994258, %v1174_v31 }
 0x23e   :  { %v1798_v50 = vclamps-f32 %v1112_v32, 1.0  ;;  %v1140_v53 = vsub.f32 1.0, %v1139_v44  ;;  %v1210_v29 = vmul.f32 %v1209_v10, %v2819_v17  ;;  %v1149_v5 = vand.u32 2147483648, %v2902_v38 }
 0x23f   :  { %v1243_v20 = vadd.f32 1.0, %v1794_v33  ;;  %v986_v41 = vsel %vm985_vm9, %v2050_v8, %v982_v47  ;;  %v1052_v6 = vmul.f32 %v1051_v36, %v2797_v22  ;;  %vm1144_vm10 = vweird.f32 %v2052_v4 }
 0x240   :  { %v1247_v63 = vadd.f32 1.0, %v1798_v50  ;;  %v991_v26 = vsel %vm2914_vm4, %v990_v16, %v986_v41  ;;  %v1141_v7 = vmul.f32 %v2052_v4, %v1140_v53  ;;  %vm2947_vm11 = vcmp.eq.f32.partialorder %v1147_v14, 8.507059e+37  ;;  %vm1145_vm12 = vmor %vm1143_vm8, %vm1144_vm10 }
 0x241   :  { %v992_v46 = vmul.f32 %v991_v26, %v2857_v19  ;;  %v1176_v23 = vmul.f32 %v1175_v34, %v2779_v40  ;;  %v1053_v27 = vadd.f32 0.112945676, %v1052_v6  ;;  %v1259_v43 = vmul.f32 %v1243_v20, %v2808_v56 }
 0x242   :  { %v2054_v8 = vpop.eup %2053  ;;  %v1263_v25 = vmul.f32 %v1247_v63, %v2853_v52  ;;  %v1142_v30 = vadd.f32 %v2052_v4, %v1141_v7  ;;  %v1211_v9 = vadd.f32 0.014752088, %v1210_v29  ;;  %v1150_v1 = vor.u32 1.1754944e-38, %v1149_v5 }
 0x243   :  { %v1795_v60 = vclamps-f32 %v992_v46, 1.0  ;;  %v1019_v19 = vmul.f32 %v2054_v8, %v2927_v49  ;;  %v2957_v21 = vadd.f32 1.0, %v1176_v23  ;;  %v1054_v11 = vmul.f32 %v1053_v27, %v2797_v22 }
 0x244   :  { %v1275_v10 = vpack.c.bf16 %v1263_v25, %v1259_v43  ;;  %v1146_v39 = vsel %vm1145_vm12, %v2052_v4, %v1142_v30  ;;  %v1212_v12 = vmul.f32 %v1211_v9, %v2819_v17  ;;  %v1042_v56 = vadd.f32 0.05243302, %v2867_v13 }
 0x245   :  { %v1151_v52 = vsel %vm2947_vm11, %v1150_v1, %v1146_v39  ;;  %v1020_v45 = vsub.f32 1.0, %v1019_v19  ;;  %2055 = vrcp.f32 %v2957_v21  ;;  %v1164_v38 = vadd.f32 0.18741608, %v2870_v37 }
 0x246   :  { %v1201_v51 = vmul.f32 %v2876_v2, %v2819_v17  ;;  %1548 = vmatmul.bf16.gmra.mxu0 %v1275_v10  ;;  %v1152_v31 = vmul.f32 %v1151_v52, %v2880_v62  ;;  %v1029_v4 = vand.u32 2147483648, %v2927_v49  ;;  %vm1024_vm13 = vweird.f32 %v2054_v8 }
 0x247   :  { %v1021_v59 = vmul.f32 %v2054_v8, %v1020_v45  ;;  %v1055_v42 = vadd.f32 0.4994258, %v1054_v11  ;;  %v1213_v13 = vadd.f32 0.112945676, %v1212_v12  ;;  %v1006_v58 = vadd.f32 1.1283791, %v2864_v48 }
 0x248   :  { %v1799_v36 = vclamps-f32 %v1152_v31, 1.0  ;;  %v1244_v32 = vadd.f32 1.0, %v1795_v60  ;;  %v1027_v16 = vand.u32 2147483647, %v2927_v49  ;;  %vm1023_vm14 = vweird.f32 %v2927_v49 }
 0x249   :  { %v1022_v44 = vadd.f32 %v2054_v8, %v1021_v59  ;;  %v1056_v37 = vmul.f32 %v1055_v42, %v2797_v22  ;;  %v1214_v2 = vmul.f32 %v1213_v13, %v2819_v17  ;;  %v1043_v62 = vmul.f32 %v1042_v56, %v2797_v22  ;;  %vm1025_vm15 = vmor %vm1023_vm14, %vm1024_vm13 }
 0x24a   :  { %v1165_v33 = vmul.f32 %v1164_v38, %v2779_v40  ;;  %v1202_v47 = vadd.f32 0.05243302, %v1201_v51  ;;  %v1248_v14 = vadd.f32 1.0, %v1799_v36  ;;  %v1030_v53 = vor.u32 1.1754944e-38, %v1029_v4 }
 0x24b   :  { %v2056_v48 = vpop.eup %2055  ;;  %v1026_v50 = vsel %vm1025_vm15, %v2054_v8, %v1022_v44  ;;  %v1057_v34 = vadd.f32 1.0, %v1056_v37  ;;  %v1215_v29 = vadd.f32 0.4994258, %v1214_v2  ;;  %v1260_v20 = vmul.f32 %v1244_v32, %v2817_v55 }
 0x24c   :  { %v1264_v49 = vmul.f32 %v1248_v14, %v2860_v0  ;;  %vm1028_vm0 = vcmp.eq.f32.partialorder %v1027_v16, 8.507059e+37  ;;  %v1179_v41 = vmul.f32 %v2056_v48, %v2957_v21  ;;  %v1007_v5 = vmul.f32 %v1006_v58, %v2640_v35 }
 0x24d   :  { %v1031_v6 = vsel %vm1028_vm0, %v1030_v53, %v1026_v50  ;;  %2057 = vrcp.f32 %v1057_v34  ;;  %v1044_v40 = vadd.f32 0.18741608, %v1043_v62  ;;  %v1216_v7 = vmul.f32 %v1215_v29, %v2819_v17 }
 0x24e   :  { %v1276_v63 = vpack.c.bf16 %v1264_v49, %v1260_v20  ;;  %v1180_v26 = vsub.f32 1.0, %v1179_v41  ;;  %v1166_v46 = vadd.f32 1.1283791, %v1165_v33  ;;  %v1203_v24 = vmul.f32 %v1202_v47, %v2819_v17 }
 0x24f   :  { %v1187_v23 = vand.u32 2147483647, %v2957_v21  ;;  %v1189_v55 = vand.u32 2147483648, %v2957_v21  ;;  %v1032_v0 = vmul.f32 %v1031_v6, %v1007_v5  ;;  %vm1184_vm1 = vweird.f32 %v2056_v48 }
 0x250   :  { %1567 = vmatmul.bf16.gmra.mxu1 %v1276_v63  ;;  %v1181_v27 = vmul.f32 %v2056_v48, %v1180_v26  ;;  %v1217_v8 = vadd.f32 1.0, %v1216_v7  ;;  %v1045_v35 = vmul.f32 %v1044_v40, %v2797_v22  ;;  %vm1183_vm2 = vweird.f32 %v2957_v21 }
 0x251   :  { %v1167_v30 = vmul.f32 %v1166_v46, %v2756_v54  ;;  %v1204_v9 = vadd.f32 0.18741608, %v1203_v24  ;;  %vm1185_vm3 = vmor %vm1183_vm2, %vm1184_vm1  ;;  %v1190_v60 = vor.u32 1.1754944e-38, %v1189_v55  ;;  %v1796_v1 = vclamps-f32 %v1032_v0, 1.0  ;;  %v2061_v55 = vld [vmem:[#allocation4] sm:$0xff] }
 0x252   :  { %v1182_v43 = vadd.f32 %v2056_v48, %v1181_v27  ;;  %2059 = vrcp.f32 %v1217_v8  ;;  %vm1188_vm4 = vcmp.eq.f32.partialorder %v1187_v23, 8.507059e+37  ;;  %v1046_v11 = vadd.f32 1.1283791, %v1045_v35 }
 0x253   :  { %v2058_v25 = vpop.eup %2057  ;;  %v1205_v22 = vmul.f32 %v1204_v9, %v2819_v17  ;;  %v1067_v52 = vand.u32 2147483647, %v1057_v34  ;;  %v1069_v45 = vand.u32 2147483648, %v1057_v34  ;;  %v1245_v51 = vadd.f32 1.0, %v1796_v1  ;;  %v2062_v9 = vld [vmem:[#allocation4 + $0x8] sm:$0xff] }
 0x254   :  { %v1186_v19 = vsel %vm1185_vm3, %v2056_v48, %v1182_v43  ;;  %v1059_v10 = vmul.f32 %v2058_v25, %v1057_v34  ;;  %vm1064_vm5 = vweird.f32 %v2058_v25  ;;  %v573_v54 = vmul.f32 0.5, %v2621_v3 }
 0x255   :  { %v1191_v39 = vsel %vm1188_vm4, %v1190_v60, %v1186_v19  ;;  %v577_v4 = vmul.f32 0.5, %v2744_v28  ;;  %v1047_v42 = vmul.f32 %v1046_v11, %v2749_v61  ;;  %vm1063_vm6 = vweird.f32 %v1057_v34 }
 0x256   :  { %v1192_v12 = vmul.f32 %v1191_v39, %v1167_v30  ;;  %v1060_v56 = vsub.f32 1.0, %v1059_v10  ;;  %v1206_v36 = vadd.f32 1.1283791, %v1205_v22  ;;  %vm1065_vm7 = vmor %vm1063_vm6, %vm1064_vm5  ;;  %vm1068_vm8 = vcmp.eq.f32.partialorder %v1067_v52, 8.507059e+37 }
 0x257   :  { %v1070_v17 = vor.u32 1.1754944e-38, %v1069_v45  ;;  %v1261_v16 = vmul.f32 %v1245_v51, %v573_v54  ;;  %v1229_v2 = vand.u32 2147483648, %v1217_v8  ;;  %v1227_v3 = vand.u32 2147483647, %v1217_v8  ;;  %v2063_v45 = vld [vmem:[#allocation4 + $0x10] sm:$0xff] }
 0x258   :  { %v2060_v21 = vpop.eup %2059  ;;  %v1800_v38 = vclamps-f32 %v1192_v12, 1.0  ;;  %v1061_v31 = vmul.f32 %v2058_v25, %v1060_v56  ;;  %vm1223_vm10 = vweird.f32 %v1217_v8  ;;  %v1207_v48 = vmul.f32 %v1206_v36, %v2792_v18  ;;  %v2016_v18 = vld [vmem:[%s3011_s6] ss:$0 sm:$0xff]  ;;  %s2175_s6 = smov [#allocation10]  }
 0x259   :  { %v1219_v59 = vmul.f32 %v2060_v21, %v1217_v8  ;;  %vm1224_vm9 = vweird.f32 %v2060_v21  ;;  %v1230_v61 = vor.u32 1.1754944e-38, %v1229_v2  ;;  %vm1228_vm12 = vcmp.eq.f32.partialorder %v1227_v3, 8.507059e+37  ;;  %s1634_s22 = sshll.u32 %s2175_s6, 4  ;;  %s1635_s22 = int_to_ptr.vmem [resolvable:$true] %s1634_s22 }
 0x25a   :  { %v1249_v13 = vadd.f32 1.0, %v1800_v38  ;;  %v1062_v58 = vadd.f32 %v2058_v25, %v1061_v31  ;;  %vm1225_vm11 = vmor %vm1223_vm10, %vm1224_vm9  ;;  %v574_v41 = vmul.f32 0.5, %v2729_v15  ;;  %v578_v5 = vmul.f32 0.5, %v2775_v57 }
 0x25b   :  { %v1220_v32 = vsub.f32 1.0, %v1219_v59  ;;  %v197_v0 = vadd.f32 %v2061_v55, %v2016_v18  ;;  %v198_v60 = vadd.f32 %v2062_v9, %v2016_v18 }
 0x25c   :  { %v1265_v44 = vmul.f32 %v1249_v13, %v577_v4  ;;  %v1066_v37 = vsel %vm1065_vm7, %v2058_v25, %v1062_v58  ;;  %v2064_v58 = vld [vmem:[#allocation4 + $0x18] sm:$0xff] }
 0x25d   :  { %v1071_v62 = vsel %vm1068_vm8, %v1070_v17, %v1066_v37  ;;  %v1221_v33 = vmul.f32 %v2060_v21, %v1220_v32  ;;  %v200_v36 = vadd.f32 %v2064_v58, %v2016_v18 }
 0x25e   :  { %v1277_v28 = vpack.c.bf16 %v1265_v44, %v1261_v16  ;;  %v1072_v47 = vmul.f32 %v1071_v62, %v1047_v42 }
 0x25f   :  { %v1222_v14 = vadd.f32 %v2060_v21, %v1221_v33 }
 0x260   :  { %1586 = vmatmul.bf16.gmra.mxu2 %v1277_v28  ;;  %v1797_v50 = vclamps-f32 %v1072_v47, 1.0 }
 0x261   :  { %v1226_v53 = vsel %vm1225_vm11, %v2060_v21, %v1222_v14  ;;  %v199_v21 = vadd.f32 %v2063_v45, %v2016_v18 }
 0x262   :  { %v1231_v34 = vsel %vm1228_vm12, %v1230_v61, %v1226_v53  ;;  %v1246_v49 = vadd.f32 1.0, %v1797_v50 }
 0x263   :  { %v1232_v29 = vmul.f32 %v1231_v34, %v1207_v48 }
 0x264   :  { %v1262_v40 = vmul.f32 %v1246_v49, %v574_v41 }
 0x265   :  { %v1801_v20 = vclamps-f32 %v1232_v29, 1.0 }
 0x267   :  { %v1250_v6 = vadd.f32 1.0, %v1801_v20 }
 0x269   :  { %v1266_v63 = vmul.f32 %v1250_v6, %v578_v5 }
 0x26b   :  { %v1278_v26 = vpack.c.bf16 %v1266_v63, %v1262_v40 }
 0x26d   :  { %1605 = vmatmul.bf16.gmra.mxu3 %v1278_v26 }
 0x291   :  { %v1544_v7 = vpop.f32.mrf.mxu0 }
 0x292   :  { %v1563_v46 = vpop.f32.mrf.mxu1 }
 0x293   :  { %v1564_v24 = vadd.f32 %v1563_v46, %v1544_v7 }
 0x299   :  { %v1546_v57 = vpop.f32.mrf.mxu0 }
 0x29a   :  { %v1582_v23 = vpop.f32.mrf.mxu2  ;;  %v1565_v43 = vpop.f32.mrf.mxu1 }
 0x29b   :  { %v1583_v27 = vadd.f32 %v1582_v23, %v1564_v24  ;;  %v1566_v25 = vadd.f32 %v1565_v43, %v1546_v57 }
 0x29e   :  { %v1601_v8 = vpop.f32.mrf.mxu3 }
 0x29f   :  { %v1602_v15 = vadd.f32 %v1601_v8, %v1583_v27 }
 0x2a1   :  { %v1611_v35 = vadd.f32 %v1602_v15, %v197_v0 }
 0x2a2   :  { %v1584_v30 = vpop.f32.mrf.mxu2 }
 0x2a3   :  { %1626 = vst [vmem:[#allocation10] sm:$0xff] %v1611_v35  ;;  %v1585_v1 = vadd.f32 %v1584_v30, %v1566_v25 }
 0x2a6   :  { %v1603_v19 = vpop.f32.mrf.mxu3 }
 0x2a7   :  { %v1604_v10 = vadd.f32 %v1603_v19, %v1585_v1 }
 0x2a9   :  { %v1612_v39 = vadd.f32 %v1604_v10, %v198_v60 }
 0x2ab   :  { %1627 = vst [vmem:[#allocation10 + $0x8] sm:$0xff] %v1612_v39 }
 0x2c3   :  { %v1549_v11 = vpop.f32.mrf.mxu0 }
 0x2cb   :  { %v1551_v38 = vpop.f32.mrf.mxu0 }
 0x2cd   :  { %v1568_v12 = vpop.f32.mrf.mxu1 }
 0x2ce   :  { %v1569_v22 = vadd.f32 %v1568_v12, %v1549_v11 }
 0x2d5   :  { %v1570_v51 = vpop.f32.mrf.mxu1 }
 0x2d6   :  { %v1571_v59 = vadd.f32 %v1570_v51, %v1551_v38 }
 0x2e3   :  { %v1587_v56 = vpop.f32.mrf.mxu2 }
 0x2e4   :  { %v1588_v52 = vadd.f32 %v1587_v56, %v1569_v22 }
 0x2eb   :  { %v1589_v4 = vpop.f32.mrf.mxu2 }
 0x2ec   :  { %v1590_v13 = vadd.f32 %v1589_v4, %v1571_v59 }
 0x2f0   :  { %v1606_v31 = vpop.f32.mrf.mxu3 }
 0x2f1   :  { %v1607_v54 = vadd.f32 %v1606_v31, %v1588_v52 }
 0x2f3   :  { %v1613_v42 = vadd.f32 %v1607_v54, %v199_v21 }
 0x2f5   :  { %1628 = vst [vmem:[#allocation10 + $0x10] sm:$0xff] %v1613_v42 }
 0x2f8   :  { %v1608_v17 = vpop.f32.mrf.mxu3 }
 0x2f9   :  { %v1609_v32 = vadd.f32 %v1608_v17, %v1590_v13 }
 0x2fb   :  { %v1614_v16 = vadd.f32 %v1609_v32, %v200_v36 }
 0x2fd   :  { %1629 = vst [vmem:[#allocation10 + $0x18] sm:$0xff] %v1614_v16 }
 0x2fe   :  { %1642 = dma.vmem_to_hbm [thread:$0]  %s1635_s22, 512, %s1637_s25, [#allocation6], %s2171_s13, %s2171_s13, %s2172_s14  }
 0x2ff   :  { %2165 = dma.done.wait [#allocation6], 512  }
 0x300   :  { %2166 = vsyncadd [#allocation6], 4294966784 }
 0x301   :  { %1647 = vsyncpa [#allocation5], 1 }
 0x302   :  { %1648 = vsyncpa [#allocation8], 1 }
 0x303   :  { %1649 = vsyncpa [#allocation6], 1 }

</bundles_post_ra>
